<compile_context>
chip_gen: v6e
topology: v6e:2x2x1
jax: 0.10.0
libtpu: 0.0.40
codegen_flags: <defaults>
</compile_context>

<pallas_src>
import math

import jax
import jax.numpy as jnp
from jax.experimental import pallas as pl
from jax.experimental.pallas import tpu as pltpu

N_ACTIONS = 2        # CartPole-v1 action space
STATE_SIZE = 4       # CartPole-v1 observation space
EMBEDDING_SIZE = 8
OBS_H1 = 16
OBS_H2 = 32
HIDDEN = 128

IN_W = STATE_SIZE + N_ACTIONS + 2        # [obs(4), act(2), 1, 0] -> 8 columns
SUBLANE = 8


def adrqn_kernel(inp_ref, wp32_ref, wp512_ref, wout_ref,
                 q_ref, h_out_ref, c_out_ref,
                 gx_ref, hs_ref):
    """Whole ADRQN forward in one kernel invocation.

    inp_ref:  (T*Bp, 8)  time-major rows; cols = [obs(4), act(2), 1, 0]
    wp32_ref: (40, 32)   rows 0:8  = MLP layer-1 weights (+b1, ones marker)
                         rows 8:40 = MLP layer-2 weights (+b2 via ones column)
    wp512_ref:(168, 512) rows 0:8   = folded action/bias projection (Wactb)
                         rows 8:40  = W_ih (obs part, 32 x 4H)
                         rows 40:168= W_hh (128 x 4H)
    wout_ref: (136, 128) rows 0:128 = W_out zero-padded, row 128 = b_out padded
    """
    TBp = inp_ref.shape[0]
    Bp, H = h_out_ref.shape
    T = TBp // Bp

    inp = inp_ref[...]                                        # (T*Bp, 8)

    # ---- time-invariant feedforward, batched over all T*Bp rows ----
    # x1 cols 0:16 = relu(obs @ w1 + b1), cols 16:31 = 0, col 31 = 1 (for b2)
    x1 = jnp.maximum(
        jnp.dot(inp, wp32_ref[0:SUBLANE, :],
                preferred_element_type=jnp.float32), 0.0)     # (T*Bp, 32)
    x2 = jnp.maximum(
        jnp.dot(x1, wp32_ref[SUBLANE:SUBLANE + OBS_H2, :],
                preferred_element_type=jnp.float32), 0.0)     # (T*Bp, 32)

    # LSTM input projection for every timestep at once (action embedding and
    # all biases are folded into the weight packs -> two matmuls, no adds).
    gx_ref[...] = (
        jnp.dot(x2, wp512_ref[SUBLANE:SUBLANE + OBS_H2, :],
                preferred_element_type=jnp.float32)
        + jnp.dot(inp, wp512_ref[0:SUBLANE, :],
                  preferred_element_type=jnp.float32))        # (T*Bp, 4H)

    whh_lo = SUBLANE + OBS_H2
    w_hh = wp512_ref[whh_lo:whh_lo + H, :]                    # (H, 4H), once

    # ---- sequential LSTM recurrence; carry stays in vregs, Bp = 8 tiles ----
    h = jnp.zeros((Bp, H), jnp.float32)                       # hidden=None
    c = jnp.zeros((Bp, H), jnp.float32)
    for t in range(T):                                        # T small & static
        g = gx_ref[t * Bp:(t + 1) * Bp, :] + jnp.dot(
            h, w_hh, preferred_element_type=jnp.float32)      # (Bp, 4H)
        i_g = jax.nn.sigmoid(g[:, 0 * H:1 * H])
        f_g = jax.nn.sigmoid(g[:, 1 * H:2 * H])
        g_g = jnp.tanh(g[:, 2 * H:3 * H])
        o_g = jax.nn.sigmoid(g[:, 3 * H:4 * H])
        c = f_g * c + i_g * g_g
        h = o_g * jnp.tanh(c)
        hs_ref[t * Bp:(t + 1) * Bp, :] = h                    # full (8,128) vst

    h_out_ref[...] = h
    c_out_ref[...] = c

    # ---- lane-dense output head applied once to the (T*Bp, H) hidden slab ----
    q_ref[...] = (jnp.dot(hs_ref[...], wout_ref[0:H, :],
                          preferred_element_type=jnp.float32)
                  + wout_ref[H:H + 1, :])                     # (T*Bp, 128)


def adrqn_forward(params, observation, action):
    """observation: (B, T, STATE_SIZE), action: (B, T, N_ACTIONS) (batch-first,
    like the PyTorch module). Returns (q_values (B, T, A), (h_n, c_n)) with
    h_n / c_n shaped (1, B, HIDDEN) to match nn.LSTM."""
    (w_emb, b_emb, w1, b1, w2, b2,
     w_ih, w_hh, b_lstm, w_out, b_out) = params

    B, T, S = observation.shape
    A = action.shape[-1]
    H = HIDDEN
    G4 = 4 * H
    Bp = ((B + SUBLANE - 1) // SUBLANE) * SUBLANE             # pad batch to 8
    TBp = T * Bp

    # ---- pack activations: time-major, batch-padded, plus a ones column ----
    obs_tm = jnp.transpose(observation, (1, 0, 2))            # (T, B, S)
    act_tm = jnp.transpose(action, (1, 0, 2))                 # (T, B, A)
    pad = ((0, 0), (0, Bp - B), (0, 0))
    obs_p = jnp.pad(obs_tm, pad)
    act_p = jnp.pad(act_tm, pad)
    ones_c = jnp.ones((T, Bp, 1), jnp.float32)
    zero_c = jnp.zeros((T, Bp, 1), jnp.float32)
    inp = jnp.concatenate([obs_p, act_p, ones_c, zero_c],
                          axis=-1).reshape(TBp, IN_W)         # (T*Bp, 8)

    # ---- fold the action embedding into the LSTM input projection (exact) ----
    w_ih_x = w_ih[:OBS_H2]                                    # (32, 4H)
    w_ih_a = w_ih[OBS_H2:]                                    # (8, 4H)
    w_act = w_emb @ w_ih_a                                    # (A, 4H)
    b_fold = b_lstm + b_emb @ w_ih_a                          # (1, 4H)

    wactb = jnp.zeros((SUBLANE, G4), jnp.float32)
    wactb = wactb.at[S:S + A].set(w_act)                      # act columns
    wactb = wactb.at[S + A].set(b_fold[0])                    # ones column
    wp512 = jnp.concatenate([wactb, w_ih_x, w_hh], axis=0)    # (168, 4H)

    # ---- MLP weight pack (biases folded via the ones column / x1 col 31) ----
    w1a = jnp.zeros((SUBLANE, OBS_H2), jnp.float32)
    w1a = w1a.at[:S, :OBS_H1].set(w1)
    w1a = w1a.at[S + A, :OBS_H1].set(b1[0])                   # +b1 via ones col
    w1a = w1a.at[S + A, OBS_H2 - 1].set(1.0)                  # x1[:,31] == 1
    w2b = jnp.zeros((OBS_H2, OBS_H2), jnp.float32)
    w2b = w2b.at[:OBS_H1].set(w2)
    w2b = w2b.at[OBS_H2 - 1].set(b2[0])                       # +b2 via x1[:,31]
    wp32 = jnp.concatenate([w1a, w2b], axis=0)                # (40, 32)

    # ---- lane-dense output head pack ----
    w_out_pad = jnp.zeros((H, H), jnp.float32).at[:, :A].set(w_out)
    b_out_pad = jnp.zeros((SUBLANE, H), jnp.float32).at[0, :A].set(b_out[0])
    wout_pack = jnp.concatenate([w_out_pad, b_out_pad], axis=0)  # (136, 128)

    def full_spec(shape):
        return pl.BlockSpec(shape, lambda i: (0,) * len(shape))

    q_pad, h_pad, c_pad = pl.pallas_call(
        adrqn_kernel,
        out_shape=(jax.ShapeDtypeStruct((TBp, H), jnp.float32),
                   jax.ShapeDtypeStruct((Bp, H), jnp.float32),
                   jax.ShapeDtypeStruct((Bp, H), jnp.float32)),
        grid=(1,),                                            # single invocation
        in_specs=[
            full_spec(inp.shape),
            full_spec(wp32.shape),
            full_spec(wp512.shape),
            full_spec(wout_pack.shape),
        ],
        out_specs=(
            full_spec((TBp, H)),
            full_spec((Bp, H)),
            full_spec((Bp, H)),
        ),
        scratch_shapes=[pltpu.VMEM((TBp, 4 * H), jnp.float32),   # gates_x
                        pltpu.VMEM((TBp, H), jnp.float32)],      # hidden slab
        compiler_params=pltpu.CompilerParams(
            dimension_semantics=("arbitrary",)),
    )(inp, wp32, wp512, wout_pack)

    # undo batch padding / lane padding outside the kernel
    q_values = jnp.transpose(q_pad.reshape(T, Bp, H)[:, :B, :A], (1, 0, 2))
    hidden_out = (h_pad[:B][None], c_pad[:B][None])           # (1, B, H)
    return q_values, hidden_out


# ---------------- plain-JAX reference (for correctness check) ---------------

def adrqn_reference(params, observation, action):
    (w_emb, b_emb, w1, b1, w2, b2,
     w_ih, w_hh, b_lstm, w_out, b_out) = params
    H = HIDDEN
    a_emb = action @ w_emb + b_emb[0]
    x = jax.nn.relu(observation @ w1 + b1[0])
    x = jax.nn.relu(x @ w2 + b2[0])
    lstm_in = jnp.concatenate([x, a_emb], axis=-1)   # (B, T, 40)
    B = lstm_in.shape[0]

    def step(carry, xt):
        h, c = carry
        gates = xt @ w_ih + h @ w_hh + b_lstm[0]
        i = jax.nn.sigmoid(gates[:, :H])
        f = jax.nn.sigmoid(gates[:, H:2 * H])
        g = jnp.tanh(gates[:, 2 * H:3 * H])
        o = jax.nn.sigmoid(gates[:, 3 * H:])
        c = f * c + i * g
        h = o * jnp.tanh(c)
        return (h, c), h

    (h, c), hs = jax.lax.scan(
        step,
        (jnp.zeros((B, H), jnp.float32), jnp.zeros((B, H), jnp.float32)),
        jnp.transpose(lstm_in, (1, 0, 2)))
    lstm_out = jnp.transpose(hs, (1, 0, 2))
    q = lstm_out @ w_out + b_out[0]
    return q, (h[None], c[None])


# ---------------------------- parameter init --------------------------------

def _linear_params(key, fan_in, fan_out):
    k1, k2 = jax.random.split(key)
    bound = 1.0 / math.sqrt(fan_in)
    w = jax.random.uniform(k1, (fan_in, fan_out), jnp.float32, -bound, bound)
    b = jax.random.uniform(k2, (1, fan_out), jnp.float32, -bound, bound)
    return w, b


def make_params(key):
    keys = jax.random.split(key, 6)
    w_emb, b_emb = _linear_params(keys[0], N_ACTIONS, EMBEDDING_SIZE)
    w1, b1 = _linear_params(keys[1], STATE_SIZE, OBS_H1)
    w2, b2 = _linear_params(keys[2], OBS_H1, OBS_H2)

    lstm_in_size = OBS_H2 + EMBEDDING_SIZE
    bound = 1.0 / math.sqrt(HIDDEN)
    k_ih, k_hh, k_b = jax.random.split(keys[3], 3)
    # stored pre-transposed: (in, 4H) / (H, 4H); gate order i, f, g, o
    w_ih = jax.random.uniform(k_ih, (lstm_in_size, 4 * HIDDEN), jnp.float32,
                              -bound, bound)
    w_hh = jax.random.uniform(k_hh, (HIDDEN, 4 * HIDDEN), jnp.float32,
                              -bound, bound)
    # b_lstm = b_ih + b_hh folded together
    b_lstm = (jax.random.uniform(k_b, (1, 4 * HIDDEN), jnp.float32,
                                 -bound, bound)
              + jax.random.uniform(jax.random.fold_in(k_b, 1),
                                   (1, 4 * HIDDEN), jnp.float32,
                                   -bound, bound))

    w_out, b_out = _linear_params(keys[4], HIDDEN, N_ACTIONS)
    return (w_emb, b_emb, w1, b1, w2, b2, w_ih, w_hh, b_lstm, w_out, b_out)


if __name__ == "__main__":
    key = jax.random.PRNGKey(0)
    k_param, k_obs, k_act = jax.random.split(key, 3)

    B, T = 2, 8
    params = make_params(k_param)

    observation = jax.random.normal(k_obs, (B, T, STATE_SIZE), jnp.float32)
    action_ids = jax.random.randint(k_act, (B, T), 0, N_ACTIONS)
    action = jax.nn.one_hot(action_ids, N_ACTIONS, dtype=jnp.float32)

    q, (h_n, c_n) = adrqn_forward(params, observation, action)
    q = jax.block_until_ready(q)
    h_n = jax.block_until_ready(h_n)
    c_n = jax.block_until_ready(c_n)

    q_ref, (h_ref, c_ref) = adrqn_reference(params, observation, action)

    assert q.shape == (B, T, N_ACTIONS)
    assert h_n.shape == (1, B, HIDDEN) and c_n.shape == (1, B, HIDDEN)
    assert jnp.allclose(q, q_ref, atol=1e-4, rtol=1e-4)
    assert jnp.allclose(h_n, h_ref, atol=1e-4, rtol=1e-4)
    assert jnp.allclose(c_n, c_ref, atol=1e-4, rtol=1e-4)

    print("KERNEL_OK")
</pallas_src>

<mosaic_0001>
module attributes {stable_mosaic.version = 11 : i64} {
  func.func @adrqn_kernel(%arg0: i32, %arg1: memref<64x8xf32, #tpu.memory_space<vmem>>, %arg2: memref<40x32xf32, #tpu.memory_space<vmem>>, %arg3: memref<168x512xf32, #tpu.memory_space<vmem>>, %arg4: memref<136x128xf32, #tpu.memory_space<vmem>>, %arg5: memref<64x128xf32, #tpu.memory_space<vmem>>, %arg6: memref<8x128xf32, #tpu.memory_space<vmem>>, %arg7: memref<8x128xf32, #tpu.memory_space<vmem>>, %arg8: memref<64x512xf32, #tpu.memory_space<vmem>>, %arg9: memref<64x128xf32, #tpu.memory_space<vmem>>) attributes {dimension_semantics = [#tpu.dimension_semantics<arbitrary>], iteration_bounds = array<i64: 1>, scalar_prefetch = 0 : i64, scratch_operands = 2 : i64, tpu.core_type = #tpu.core_type<tc>, window_params = [{pipeline_mode = #tpu.pipeline_mode<synchronous>, transform_indices = @transform_0, window_bounds = array<i64: 64, 8>}, {pipeline_mode = #tpu.pipeline_mode<synchronous>, transform_indices = @transform_1, window_bounds = array<i64: 40, 32>}, {pipeline_mode = #tpu.pipeline_mode<synchronous>, transform_indices = @transform_2, window_bounds = array<i64: 168, 512>}, {pipeline_mode = #tpu.pipeline_mode<synchronous>, transform_indices = @transform_3, window_bounds = array<i64: 136, 128>}, {pipeline_mode = #tpu.pipeline_mode<synchronous>, transform_indices = @transform_4, window_bounds = array<i64: 64, 128>}, {pipeline_mode = #tpu.pipeline_mode<synchronous>, transform_indices = @transform_5, window_bounds = array<i64: 8, 128>}, {pipeline_mode = #tpu.pipeline_mode<synchronous>, transform_indices = @transform_6, window_bounds = array<i64: 8, 128>}]} {
    %c0 = arith.constant 0 : index
    %c0_0 = arith.constant 0 : index
    %0 = vector.load %arg1[%c0, %c0_0] : memref<64x8xf32, #tpu.memory_space<vmem>>, vector<64x8xf32>
    %c0_1 = arith.constant 0 : index
    %c0_2 = arith.constant 0 : index
    %1 = vector.load %arg2[%c0_1, %c0_2] : memref<40x32xf32, #tpu.memory_space<vmem>>, vector<8x32xf32>
    %cst = arith.constant dense<0.000000e+00> : vector<64x32xf32>
    %2 = tpu.matmul %0, %1, %cst {dimension_numbers = #tpu.dot_dimension_numbers<[1], [0], [0], [1], [0, 0, 1, 1], [], []>} : vector<64x8xf32>, vector<8x32xf32>, vector<64x32xf32> -> vector<64x32xf32>
    %cst_3 = arith.constant 0.000000e+00 : f32
    %3 = vector.broadcast %cst_3 : f32 to vector<64x32xf32>
    %4 = arith.maximumf %2, %3 : vector<64x32xf32>
    %c8 = arith.constant 8 : index
    %c0_4 = arith.constant 0 : index
    %5 = vector.load %arg2[%c8, %c0_4] : memref<40x32xf32, #tpu.memory_space<vmem>>, vector<32x32xf32>
    %cst_5 = arith.constant dense<0.000000e+00> : vector<64x32xf32>
    %6 = tpu.matmul %4, %5, %cst_5 {dimension_numbers = #tpu.dot_dimension_numbers<[1], [0], [0], [1], [0, 0, 1, 1], [], []>} : vector<64x32xf32>, vector<32x32xf32>, vector<64x32xf32> -> vector<64x32xf32>
    %cst_6 = arith.constant 0.000000e+00 : f32
    %7 = vector.broadcast %cst_6 : f32 to vector<64x32xf32>
    %8 = arith.maximumf %6, %7 : vector<64x32xf32>
    %c8_7 = arith.constant 8 : index
    %c0_8 = arith.constant 0 : index
    %9 = vector.load %arg3[%c8_7, %c0_8] : memref<168x512xf32, #tpu.memory_space<vmem>>, vector<32x512xf32>
    %cst_9 = arith.constant dense<0.000000e+00> : vector<64x512xf32>
    %10 = tpu.matmul %8, %9, %cst_9 {dimension_numbers = #tpu.dot_dimension_numbers<[1], [0], [0], [1], [0, 0, 1, 1], [], []>} : vector<64x32xf32>, vector<32x512xf32>, vector<64x512xf32> -> vector<64x512xf32>
    %c0_10 = arith.constant 0 : index
    %c0_11 = arith.constant 0 : index
    %11 = vector.load %arg3[%c0_10, %c0_11] : memref<168x512xf32, #tpu.memory_space<vmem>>, vector<8x512xf32>
    %cst_12 = arith.constant dense<0.000000e+00> : vector<64x512xf32>
    %12 = tpu.matmul %0, %11, %cst_12 {dimension_numbers = #tpu.dot_dimension_numbers<[1], [0], [0], [1], [0, 0, 1, 1], [], []>} : vector<64x8xf32>, vector<8x512xf32>, vector<64x512xf32> -> vector<64x512xf32>
    %13 = arith.addf %10, %12 : vector<64x512xf32>
    %c0_13 = arith.constant 0 : index
    %c0_14 = arith.constant 0 : index
    %14 = vector.load %arg8[%c0_13, %c0_14] : memref<64x512xf32, #tpu.memory_space<vmem>>, vector<64x512xf32>
    tpu.vector_store %arg8[%c0_13, %c0_14], %13 {strides = array<i32>} : memref<64x512xf32, #tpu.memory_space<vmem>>, vector<64x512xf32>,
    %c40 = arith.constant 40 : index
    %c0_15 = arith.constant 0 : index
    %15 = vector.load %arg3[%c40, %c0_15] : memref<168x512xf32, #tpu.memory_space<vmem>>, vector<128x512xf32>
    %cst_16 = arith.constant 0.000000e+00 : f32
    %16 = vector.broadcast %cst_16 : f32 to vector<8x128xf32>
    %cst_17 = arith.constant 0.000000e+00 : f32
    %17 = vector.broadcast %cst_17 : f32 to vector<8x128xf32>
    %c0_18 = arith.constant 0 : index
    %c0_19 = arith.constant 0 : index
    %18 = vector.load %arg8[%c0_18, %c0_19] : memref<64x512xf32, #tpu.memory_space<vmem>>, vector<8x512xf32>
    %cst_20 = arith.constant dense<0.000000e+00> : vector<8x512xf32>
    %19 = tpu.matmul %16, %15, %cst_20 {dimension_numbers = #tpu.dot_dimension_numbers<[1], [0], [0], [1], [0, 0, 1, 1], [], []>} : vector<8x128xf32>, vector<128x512xf32>, vector<8x512xf32> -> vector<8x512xf32>
    %20 = arith.addf %18, %19 : vector<8x512xf32>
    %21 = vector.extract_strided_slice %20 {offsets = [0, 0], sizes = [8, 128], strides = [1, 1]} : vector<8x512xf32> to vector<8x128xf32>
    %22 = arith.negf %21 : vector<8x128xf32>
    %23 = math.exp %22 : vector<8x128xf32>
    %cst_21 = arith.constant 1.000000e+00 : f32
    %24 = vector.broadcast %cst_21 : f32 to vector<8x128xf32>
    %25 = arith.addf %24, %23 : vector<8x128xf32>
    %26 = arith.divf %24, %25 : vector<8x128xf32>
    %27 = vector.extract_strided_slice %20 {offsets = [0, 128], sizes = [8, 128], strides = [1, 1]} : vector<8x512xf32> to vector<8x128xf32>
    %28 = arith.negf %27 : vector<8x128xf32>
    %29 = math.exp %28 : vector<8x128xf32>
    %cst_22 = arith.constant 1.000000e+00 : f32
    %30 = vector.broadcast %cst_22 : f32 to vector<8x128xf32>
    %31 = arith.addf %30, %29 : vector<8x128xf32>
    %32 = arith.divf %30, %31 : vector<8x128xf32>
    %33 = vector.extract_strided_slice %20 {offsets = [0, 256], sizes = [8, 128], strides = [1, 1]} : vector<8x512xf32> to vector<8x128xf32>
    %34 = math.tanh %33 : vector<8x128xf32>
    %35 = vector.extract_strided_slice %20 {offsets = [0, 384], sizes = [8, 128], strides = [1, 1]} : vector<8x512xf32> to vector<8x128xf32>
    %36 = arith.negf %35 : vector<8x128xf32>
    %37 = math.exp %36 : vector<8x128xf32>
    %cst_23 = arith.constant 1.000000e+00 : f32
    %38 = vector.broadcast %cst_23 : f32 to vector<8x128xf32>
    %39 = arith.addf %38, %37 : vector<8x128xf32>
    %40 = arith.divf %38, %39 : vector<8x128xf32>
    %41 = arith.mulf %32, %17 : vector<8x128xf32>
    %42 = arith.mulf %26, %34 : vector<8x128xf32>
    %43 = arith.addf %41, %42 : vector<8x128xf32>
    %44 = math.tanh %43 : vector<8x128xf32>
    %45 = arith.mulf %40, %44 : vector<8x128xf32>
    %c0_24 = arith.constant 0 : index
    %c0_25 = arith.constant 0 : index
    %46 = vector.load %arg9[%c0_24, %c0_25] : memref<64x128xf32, #tpu.memory_space<vmem>>, vector<8x128xf32>
    tpu.vector_store %arg9[%c0_24, %c0_25], %45 {strides = array<i32>} : memref<64x128xf32, #tpu.memory_space<vmem>>, vector<8x128xf32>,
    %c8_26 = arith.constant 8 : index
    %c0_27 = arith.constant 0 : index
    %47 = vector.load %arg8[%c8_26, %c0_27] : memref<64x512xf32, #tpu.memory_space<vmem>>, vector<8x512xf32>
    %cst_28 = arith.constant dense<0.000000e+00> : vector<8x512xf32>
    %48 = tpu.matmul %45, %15, %cst_28 {dimension_numbers = #tpu.dot_dimension_numbers<[1], [0], [0], [1], [0, 0, 1, 1], [], []>} : vector<8x128xf32>, vector<128x512xf32>, vector<8x512xf32> -> vector<8x512xf32>
    %49 = arith.addf %47, %48 : vector<8x512xf32>
    %50 = vector.extract_strided_slice %49 {offsets = [0, 0], sizes = [8, 128], strides = [1, 1]} : vector<8x512xf32> to vector<8x128xf32>
    %51 = arith.negf %50 : vector<8x128xf32>
    %52 = math.exp %51 : vector<8x128xf32>
    %cst_29 = arith.constant 1.000000e+00 : f32
    %53 = vector.broadcast %cst_29 : f32 to vector<8x128xf32>
    %54 = arith.addf %53, %52 : vector<8x128xf32>
    %55 = arith.divf %53, %54 : vector<8x128xf32>
    %56 = vector.extract_strided_slice %49 {offsets = [0, 128], sizes = [8, 128], strides = [1, 1]} : vector<8x512xf32> to vector<8x128xf32>
    %57 = arith.negf %56 : vector<8x128xf32>
    %58 = math.exp %57 : vector<8x128xf32>
    %cst_30 = arith.constant 1.000000e+00 : f32
    %59 = vector.broadcast %cst_30 : f32 to vector<8x128xf32>
    %60 = arith.addf %59, %58 : vector<8x128xf32>
    %61 = arith.divf %59, %60 : vector<8x128xf32>
    %62 = vector.extract_strided_slice %49 {offsets = [0, 256], sizes = [8, 128], strides = [1, 1]} : vector<8x512xf32> to vector<8x128xf32>
    %63 = math.tanh %62 : vector<8x128xf32>
    %64 = vector.extract_strided_slice %49 {offsets = [0, 384], sizes = [8, 128], strides = [1, 1]} : vector<8x512xf32> to vector<8x128xf32>
    %65 = arith.negf %64 : vector<8x128xf32>
    %66 = math.exp %65 : vector<8x128xf32>
    %cst_31 = arith.constant 1.000000e+00 : f32
    %67 = vector.broadcast %cst_31 : f32 to vector<8x128xf32>
    %68 = arith.addf %67, %66 : vector<8x128xf32>
    %69 = arith.divf %67, %68 : vector<8x128xf32>
    %70 = arith.mulf %61, %43 : vector<8x128xf32>
    %71 = arith.mulf %55, %63 : vector<8x128xf32>
    %72 = arith.addf %70, %71 : vector<8x128xf32>
    %73 = math.tanh %72 : vector<8x128xf32>
    %74 = arith.mulf %69, %73 : vector<8x128xf32>
    %c8_32 = arith.constant 8 : index
    %c0_33 = arith.constant 0 : index
    %75 = vector.load %arg9[%c8_32, %c0_33] : memref<64x128xf32, #tpu.memory_space<vmem>>, vector<8x128xf32>
    tpu.vector_store %arg9[%c8_32, %c0_33], %74 {strides = array<i32>} : memref<64x128xf32, #tpu.memory_space<vmem>>, vector<8x128xf32>,
    %c16 = arith.constant 16 : index
    %c0_34 = arith.constant 0 : index
    %76 = vector.load %arg8[%c16, %c0_34] : memref<64x512xf32, #tpu.memory_space<vmem>>, vector<8x512xf32>
    %cst_35 = arith.constant dense<0.000000e+00> : vector<8x512xf32>
    %77 = tpu.matmul %74, %15, %cst_35 {dimension_numbers = #tpu.dot_dimension_numbers<[1], [0], [0], [1], [0, 0, 1, 1], [], []>} : vector<8x128xf32>, vector<128x512xf32>, vector<8x512xf32> -> vector<8x512xf32>
    %78 = arith.addf %76, %77 : vector<8x512xf32>
    %79 = vector.extract_strided_slice %78 {offsets = [0, 0], sizes = [8, 128], strides = [1, 1]} : vector<8x512xf32> to vector<8x128xf32>
    %80 = arith.negf %79 : vector<8x128xf32>
    %81 = math.exp %80 : vector<8x128xf32>
    %cst_36 = arith.constant 1.000000e+00 : f32
    %82 = vector.broadcast %cst_36 : f32 to vector<8x128xf32>
    %83 = arith.addf %82, %81 : vector<8x128xf32>
    %84 = arith.divf %82, %83 : vector<8x128xf32>
    %85 = vector.extract_strided_slice %78 {offsets = [0, 128], sizes = [8, 128], strides = [1, 1]} : vector<8x512xf32> to vector<8x128xf32>
    %86 = arith.negf %85 : vector<8x128xf32>
    %87 = math.exp %86 : vector<8x128xf32>
    %cst_37 = arith.constant 1.000000e+00 : f32
    %88 = vector.broadcast %cst_37 : f32 to vector<8x128xf32>
    %89 = arith.addf %88, %87 : vector<8x128xf32>
    %90 = arith.divf %88, %89 : vector<8x128xf32>
    %91 = vector.extract_strided_slice %78 {offsets = [0, 256], sizes = [8, 128], strides = [1, 1]} : vector<8x512xf32> to vector<8x128xf32>
    %92 = math.tanh %91 : vector<8x128xf32>
    %93 = vector.extract_strided_slice %78 {offsets = [0, 384], sizes = [8, 128], strides = [1, 1]} : vector<8x512xf32> to vector<8x128xf32>
    %94 = arith.negf %93 : vector<8x128xf32>
    %95 = math.exp %94 : vector<8x128xf32>
    %cst_38 = arith.constant 1.000000e+00 : f32
    %96 = vector.broadcast %cst_38 : f32 to vector<8x128xf32>
    %97 = arith.addf %96, %95 : vector<8x128xf32>
    %98 = arith.divf %96, %97 : vector<8x128xf32>
    %99 = arith.mulf %90, %72 : vector<8x128xf32>
    %100 = arith.mulf %84, %92 : vector<8x128xf32>
    %101 = arith.addf %99, %100 : vector<8x128xf32>
    %102 = math.tanh %101 : vector<8x128xf32>
    %103 = arith.mulf %98, %102 : vector<8x128xf32>
    %c16_39 = arith.constant 16 : index
    %c0_40 = arith.constant 0 : index
    %104 = vector.load %arg9[%c16_39, %c0_40] : memref<64x128xf32, #tpu.memory_space<vmem>>, vector<8x128xf32>
    tpu.vector_store %arg9[%c16_39, %c0_40], %103 {strides = array<i32>} : memref<64x128xf32, #tpu.memory_space<vmem>>, vector<8x128xf32>,
    %c24 = arith.constant 24 : index
    %c0_41 = arith.constant 0 : index
    %105 = vector.load %arg8[%c24, %c0_41] : memref<64x512xf32, #tpu.memory_space<vmem>>, vector<8x512xf32>
    %cst_42 = arith.constant dense<0.000000e+00> : vector<8x512xf32>
    %106 = tpu.matmul %103, %15, %cst_42 {dimension_numbers = #tpu.dot_dimension_numbers<[1], [0], [0], [1], [0, 0, 1, 1], [], []>} : vector<8x128xf32>, vector<128x512xf32>, vector<8x512xf32> -> vector<8x512xf32>
    %107 = arith.addf %105, %106 : vector<8x512xf32>
    %108 = vector.extract_strided_slice %107 {offsets = [0, 0], sizes = [8, 128], strides = [1, 1]} : vector<8x512xf32> to vector<8x128xf32>
    %109 = arith.negf %108 : vector<8x128xf32>
    %110 = math.exp %109 : vector<8x128xf32>
    %cst_43 = arith.constant 1.000000e+00 : f32
    %111 = vector.broadcast %cst_43 : f32 to vector<8x128xf32>
    %112 = arith.addf %111, %110 : vector<8x128xf32>
    %113 = arith.divf %111, %112 : vector<8x128xf32>
    %114 = vector.extract_strided_slice %107 {offsets = [0, 128], sizes = [8, 128], strides = [1, 1]} : vector<8x512xf32> to vector<8x128xf32>
    %115 = arith.negf %114 : vector<8x128xf32>
    %116 = math.exp %115 : vector<8x128xf32>
    %cst_44 = arith.constant 1.000000e+00 : f32
    %117 = vector.broadcast %cst_44 : f32 to vector<8x128xf32>
    %118 = arith.addf %117, %116 : vector<8x128xf32>
    %119 = arith.divf %117, %118 : vector<8x128xf32>
    %120 = vector.extract_strided_slice %107 {offsets = [0, 256], sizes = [8, 128], strides = [1, 1]} : vector<8x512xf32> to vector<8x128xf32>
    %121 = math.tanh %120 : vector<8x128xf32>
    %122 = vector.extract_strided_slice %107 {offsets = [0, 384], sizes = [8, 128], strides = [1, 1]} : vector<8x512xf32> to vector<8x128xf32>
    %123 = arith.negf %122 : vector<8x128xf32>
    %124 = math.exp %123 : vector<8x128xf32>
    %cst_45 = arith.constant 1.000000e+00 : f32
    %125 = vector.broadcast %cst_45 : f32 to vector<8x128xf32>
    %126 = arith.addf %125, %124 : vector<8x128xf32>
    %127 = arith.divf %125, %126 : vector<8x128xf32>
    %128 = arith.mulf %119, %101 : vector<8x128xf32>
    %129 = arith.mulf %113, %121 : vector<8x128xf32>
    %130 = arith.addf %128, %129 : vector<8x128xf32>
    %131 = math.tanh %130 : vector<8x128xf32>
    %132 = arith.mulf %127, %131 : vector<8x128xf32>
    %c24_46 = arith.constant 24 : index
    %c0_47 = arith.constant 0 : index
    %133 = vector.load %arg9[%c24_46, %c0_47] : memref<64x128xf32, #tpu.memory_space<vmem>>, vector<8x128xf32>
    tpu.vector_store %arg9[%c24_46, %c0_47], %132 {strides = array<i32>} : memref<64x128xf32, #tpu.memory_space<vmem>>, vector<8x128xf32>,
    %c32 = arith.constant 32 : index
    %c0_48 = arith.constant 0 : index
    %134 = vector.load %arg8[%c32, %c0_48] : memref<64x512xf32, #tpu.memory_space<vmem>>, vector<8x512xf32>
    %cst_49 = arith.constant dense<0.000000e+00> : vector<8x512xf32>
    %135 = tpu.matmul %132, %15, %cst_49 {dimension_numbers = #tpu.dot_dimension_numbers<[1], [0], [0], [1], [0, 0, 1, 1], [], []>} : vector<8x128xf32>, vector<128x512xf32>, vector<8x512xf32> -> vector<8x512xf32>
    %136 = arith.addf %134, %135 : vector<8x512xf32>
    %137 = vector.extract_strided_slice %136 {offsets = [0, 0], sizes = [8, 128], strides = [1, 1]} : vector<8x512xf32> to vector<8x128xf32>
    %138 = arith.negf %137 : vector<8x128xf32>
    %139 = math.exp %138 : vector<8x128xf32>
    %cst_50 = arith.constant 1.000000e+00 : f32
    %140 = vector.broadcast %cst_50 : f32 to vector<8x128xf32>
    %141 = arith.addf %140, %139 : vector<8x128xf32>
    %142 = arith.divf %140, %141 : vector<8x128xf32>
    %143 = vector.extract_strided_slice %136 {offsets = [0, 128], sizes = [8, 128], strides = [1, 1]} : vector<8x512xf32> to vector<8x128xf32>
    %144 = arith.negf %143 : vector<8x128xf32>
    %145 = math.exp %144 : vector<8x128xf32>
    %cst_51 = arith.constant 1.000000e+00 : f32
    %146 = vector.broadcast %cst_51 : f32 to vector<8x128xf32>
    %147 = arith.addf %146, %145 : vector<8x128xf32>
    %148 = arith.divf %146, %147 : vector<8x128xf32>
    %149 = vector.extract_strided_slice %136 {offsets = [0, 256], sizes = [8, 128], strides = [1, 1]} : vector<8x512xf32> to vector<8x128xf32>
    %150 = math.tanh %149 : vector<8x128xf32>
    %151 = vector.extract_strided_slice %136 {offsets = [0, 384], sizes = [8, 128], strides = [1, 1]} : vector<8x512xf32> to vector<8x128xf32>
    %152 = arith.negf %151 : vector<8x128xf32>
    %153 = math.exp %152 : vector<8x128xf32>
    %cst_52 = arith.constant 1.000000e+00 : f32
    %154 = vector.broadcast %cst_52 : f32 to vector<8x128xf32>
    %155 = arith.addf %154, %153 : vector<8x128xf32>
    %156 = arith.divf %154, %155 : vector<8x128xf32>
    %157 = arith.mulf %148, %130 : vector<8x128xf32>
    %158 = arith.mulf %142, %150 : vector<8x128xf32>
    %159 = arith.addf %157, %158 : vector<8x128xf32>
    %160 = math.tanh %159 : vector<8x128xf32>
    %161 = arith.mulf %156, %160 : vector<8x128xf32>
    %c32_53 = arith.constant 32 : index
    %c0_54 = arith.constant 0 : index
    %162 = vector.load %arg9[%c32_53, %c0_54] : memref<64x128xf32, #tpu.memory_space<vmem>>, vector<8x128xf32>
    tpu.vector_store %arg9[%c32_53, %c0_54], %161 {strides = array<i32>} : memref<64x128xf32, #tpu.memory_space<vmem>>, vector<8x128xf32>,
    %c40_55 = arith.constant 40 : index
    %c0_56 = arith.constant 0 : index
    %163 = vector.load %arg8[%c40_55, %c0_56] : memref<64x512xf32, #tpu.memory_space<vmem>>, vector<8x512xf32>
    %cst_57 = arith.constant dense<0.000000e+00> : vector<8x512xf32>
    %164 = tpu.matmul %161, %15, %cst_57 {dimension_numbers = #tpu.dot_dimension_numbers<[1], [0], [0], [1], [0, 0, 1, 1], [], []>} : vector<8x128xf32>, vector<128x512xf32>, vector<8x512xf32> -> vector<8x512xf32>
    %165 = arith.addf %163, %164 : vector<8x512xf32>
    %166 = vector.extract_strided_slice %165 {offsets = [0, 0], sizes = [8, 128], strides = [1, 1]} : vector<8x512xf32> to vector<8x128xf32>
    %167 = arith.negf %166 : vector<8x128xf32>
    %168 = math.exp %167 : vector<8x128xf32>
    %cst_58 = arith.constant 1.000000e+00 : f32
    %169 = vector.broadcast %cst_58 : f32 to vector<8x128xf32>
    %170 = arith.addf %169, %168 : vector<8x128xf32>
    %171 = arith.divf %169, %170 : vector<8x128xf32>
    %172 = vector.extract_strided_slice %165 {offsets = [0, 128], sizes = [8, 128], strides = [1, 1]} : vector<8x512xf32> to vector<8x128xf32>
    %173 = arith.negf %172 : vector<8x128xf32>
    %174 = math.exp %173 : vector<8x128xf32>
    %cst_59 = arith.constant 1.000000e+00 : f32
    %175 = vector.broadcast %cst_59 : f32 to vector<8x128xf32>
    %176 = arith.addf %175, %174 : vector<8x128xf32>
    %177 = arith.divf %175, %176 : vector<8x128xf32>
    %178 = vector.extract_strided_slice %165 {offsets = [0, 256], sizes = [8, 128], strides = [1, 1]} : vector<8x512xf32> to vector<8x128xf32>
    %179 = math.tanh %178 : vector<8x128xf32>
    %180 = vector.extract_strided_slice %165 {offsets = [0, 384], sizes = [8, 128], strides = [1, 1]} : vector<8x512xf32> to vector<8x128xf32>
    %181 = arith.negf %180 : vector<8x128xf32>
    %182 = math.exp %181 : vector<8x128xf32>
    %cst_60 = arith.constant 1.000000e+00 : f32
    %183 = vector.broadcast %cst_60 : f32 to vector<8x128xf32>
    %184 = arith.addf %183, %182 : vector<8x128xf32>
    %185 = arith.divf %183, %184 : vector<8x128xf32>
    %186 = arith.mulf %177, %159 : vector<8x128xf32>
    %187 = arith.mulf %171, %179 : vector<8x128xf32>
    %188 = arith.addf %186, %187 : vector<8x128xf32>
    %189 = math.tanh %188 : vector<8x128xf32>
    %190 = arith.mulf %185, %189 : vector<8x128xf32>
    %c40_61 = arith.constant 40 : index
    %c0_62 = arith.constant 0 : index
    %191 = vector.load %arg9[%c40_61, %c0_62] : memref<64x128xf32, #tpu.memory_space<vmem>>, vector<8x128xf32>
    tpu.vector_store %arg9[%c40_61, %c0_62], %190 {strides = array<i32>} : memref<64x128xf32, #tpu.memory_space<vmem>>, vector<8x128xf32>,
    %c48 = arith.constant 48 : index
    %c0_63 = arith.constant 0 : index
    %192 = vector.load %arg8[%c48, %c0_63] : memref<64x512xf32, #tpu.memory_space<vmem>>, vector<8x512xf32>
    %cst_64 = arith.constant dense<0.000000e+00> : vector<8x512xf32>
    %193 = tpu.matmul %190, %15, %cst_64 {dimension_numbers = #tpu.dot_dimension_numbers<[1], [0], [0], [1], [0, 0, 1, 1], [], []>} : vector<8x128xf32>, vector<128x512xf32>, vector<8x512xf32> -> vector<8x512xf32>
    %194 = arith.addf %192, %193 : vector<8x512xf32>
    %195 = vector.extract_strided_slice %194 {offsets = [0, 0], sizes = [8, 128], strides = [1, 1]} : vector<8x512xf32> to vector<8x128xf32>
    %196 = arith.negf %195 : vector<8x128xf32>
    %197 = math.exp %196 : vector<8x128xf32>
    %cst_65 = arith.constant 1.000000e+00 : f32
    %198 = vector.broadcast %cst_65 : f32 to vector<8x128xf32>
    %199 = arith.addf %198, %197 : vector<8x128xf32>
    %200 = arith.divf %198, %199 : vector<8x128xf32>
    %201 = vector.extract_strided_slice %194 {offsets = [0, 128], sizes = [8, 128], strides = [1, 1]} : vector<8x512xf32> to vector<8x128xf32>
    %202 = arith.negf %201 : vector<8x128xf32>
    %203 = math.exp %202 : vector<8x128xf32>
    %cst_66 = arith.constant 1.000000e+00 : f32
    %204 = vector.broadcast %cst_66 : f32 to vector<8x128xf32>
    %205 = arith.addf %204, %203 : vector<8x128xf32>
    %206 = arith.divf %204, %205 : vector<8x128xf32>
    %207 = vector.extract_strided_slice %194 {offsets = [0, 256], sizes = [8, 128], strides = [1, 1]} : vector<8x512xf32> to vector<8x128xf32>
    %208 = math.tanh %207 : vector<8x128xf32>
    %209 = vector.extract_strided_slice %194 {offsets = [0, 384], sizes = [8, 128], strides = [1, 1]} : vector<8x512xf32> to vector<8x128xf32>
    %210 = arith.negf %209 : vector<8x128xf32>
    %211 = math.exp %210 : vector<8x128xf32>
    %cst_67 = arith.constant 1.000000e+00 : f32
    %212 = vector.broadcast %cst_67 : f32 to vector<8x128xf32>
    %213 = arith.addf %212, %211 : vector<8x128xf32>
    %214 = arith.divf %212, %213 : vector<8x128xf32>
    %215 = arith.mulf %206, %188 : vector<8x128xf32>
    %216 = arith.mulf %200, %208 : vector<8x128xf32>
    %217 = arith.addf %215, %216 : vector<8x128xf32>
    %218 = math.tanh %217 : vector<8x128xf32>
    %219 = arith.mulf %214, %218 : vector<8x128xf32>
    %c48_68 = arith.constant 48 : index
    %c0_69 = arith.constant 0 : index
    %220 = vector.load %arg9[%c48_68, %c0_69] : memref<64x128xf32, #tpu.memory_space<vmem>>, vector<8x128xf32>
    tpu.vector_store %arg9[%c48_68, %c0_69], %219 {strides = array<i32>} : memref<64x128xf32, #tpu.memory_space<vmem>>, vector<8x128xf32>,
    %c56 = arith.constant 56 : index
    %c0_70 = arith.constant 0 : index
    %221 = vector.load %arg8[%c56, %c0_70] : memref<64x512xf32, #tpu.memory_space<vmem>>, vector<8x512xf32>
    %cst_71 = arith.constant dense<0.000000e+00> : vector<8x512xf32>
    %222 = tpu.matmul %219, %15, %cst_71 {dimension_numbers = #tpu.dot_dimension_numbers<[1], [0], [0], [1], [0, 0, 1, 1], [], []>} : vector<8x128xf32>, vector<128x512xf32>, vector<8x512xf32> -> vector<8x512xf32>
    %223 = arith.addf %221, %222 : vector<8x512xf32>
    %224 = vector.extract_strided_slice %223 {offsets = [0, 0], sizes = [8, 128], strides = [1, 1]} : vector<8x512xf32> to vector<8x128xf32>
    %225 = arith.negf %224 : vector<8x128xf32>
    %226 = math.exp %225 : vector<8x128xf32>
    %cst_72 = arith.constant 1.000000e+00 : f32
    %227 = vector.broadcast %cst_72 : f32 to vector<8x128xf32>
    %228 = arith.addf %227, %226 : vector<8x128xf32>
    %229 = arith.divf %227, %228 : vector<8x128xf32>
    %230 = vector.extract_strided_slice %223 {offsets = [0, 128], sizes = [8, 128], strides = [1, 1]} : vector<8x512xf32> to vector<8x128xf32>
    %231 = arith.negf %230 : vector<8x128xf32>
    %232 = math.exp %231 : vector<8x128xf32>
    %cst_73 = arith.constant 1.000000e+00 : f32
    %233 = vector.broadcast %cst_73 : f32 to vector<8x128xf32>
    %234 = arith.addf %233, %232 : vector<8x128xf32>
    %235 = arith.divf %233, %234 : vector<8x128xf32>
    %236 = vector.extract_strided_slice %223 {offsets = [0, 256], sizes = [8, 128], strides = [1, 1]} : vector<8x512xf32> to vector<8x128xf32>
    %237 = math.tanh %236 : vector<8x128xf32>
    %238 = vector.extract_strided_slice %223 {offsets = [0, 384], sizes = [8, 128], strides = [1, 1]} : vector<8x512xf32> to vector<8x128xf32>
    %239 = arith.negf %238 : vector<8x128xf32>
    %240 = math.exp %239 : vector<8x128xf32>
    %cst_74 = arith.constant 1.000000e+00 : f32
    %241 = vector.broadcast %cst_74 : f32 to vector<8x128xf32>
    %242 = arith.addf %241, %240 : vector<8x128xf32>
    %243 = arith.divf %241, %242 : vector<8x128xf32>
    %244 = arith.mulf %235, %217 : vector<8x128xf32>
    %245 = arith.mulf %229, %237 : vector<8x128xf32>
    %246 = arith.addf %244, %245 : vector<8x128xf32>
    %247 = math.tanh %246 : vector<8x128xf32>
    %248 = arith.mulf %243, %247 : vector<8x128xf32>
    %c56_75 = arith.constant 56 : index
    %c0_76 = arith.constant 0 : index
    %249 = vector.load %arg9[%c56_75, %c0_76] : memref<64x128xf32, #tpu.memory_space<vmem>>, vector<8x128xf32>
    tpu.vector_store %arg9[%c56_75, %c0_76], %248 {strides = array<i32>} : memref<64x128xf32, #tpu.memory_space<vmem>>, vector<8x128xf32>,
    %c0_77 = arith.constant 0 : index
    %c0_78 = arith.constant 0 : index
    %250 = vector.load %arg6[%c0_77, %c0_78] : memref<8x128xf32, #tpu.memory_space<vmem>>, vector<8x128xf32>
    tpu.vector_store %arg6[%c0_77, %c0_78], %248 {strides = array<i32>} : memref<8x128xf32, #tpu.memory_space<vmem>>, vector<8x128xf32>,
    %c0_79 = arith.constant 0 : index
    %c0_80 = arith.constant 0 : index
    %251 = vector.load %arg7[%c0_79, %c0_80] : memref<8x128xf32, #tpu.memory_space<vmem>>, vector<8x128xf32>
    tpu.vector_store %arg7[%c0_79, %c0_80], %246 {strides = array<i32>} : memref<8x128xf32, #tpu.memory_space<vmem>>, vector<8x128xf32>,
    %c0_81 = arith.constant 0 : index
    %c0_82 = arith.constant 0 : index
    %252 = vector.load %arg9[%c0_81, %c0_82] : memref<64x128xf32, #tpu.memory_space<vmem>>, vector<64x128xf32>
    %c0_83 = arith.constant 0 : index
    %c0_84 = arith.constant 0 : index
    %253 = vector.load %arg4[%c0_83, %c0_84] : memref<136x128xf32, #tpu.memory_space<vmem>>, vector<128x128xf32>
    %cst_85 = arith.constant dense<0.000000e+00> : vector<64x128xf32>
    %254 = tpu.matmul %252, %253, %cst_85 {dimension_numbers = #tpu.dot_dimension_numbers<[1], [0], [0], [1], [0, 0, 1, 1], [], []>} : vector<64x128xf32>, vector<128x128xf32>, vector<64x128xf32> -> vector<64x128xf32>
    %c128 = arith.constant 128 : index
    %c0_86 = arith.constant 0 : index
    %255 = vector.load %arg4[%c128, %c0_86] : memref<136x128xf32, #tpu.memory_space<vmem>>, vector<1x128xf32>
    %256 = vector.broadcast %255 : vector<1x128xf32> to vector<64x128xf32>
    %257 = arith.addf %254, %256 : vector<64x128xf32>
    %c0_87 = arith.constant 0 : index
    %c0_88 = arith.constant 0 : index
    %258 = vector.load %arg5[%c0_87, %c0_88] : memref<64x128xf32, #tpu.memory_space<vmem>>, vector<64x128xf32>
    tpu.vector_store %arg5[%c0_87, %c0_88], %257 {strides = array<i32>} : memref<64x128xf32, #tpu.memory_space<vmem>>, vector<64x128xf32>,
    return
  }
  func.func @transform_0(%arg0: i32) -> (i32, i32) {
    %c0_i32 = arith.constant 0 : i32
    %c0_i32_0 = arith.constant 0 : i32
    %c0_i32_1 = arith.constant 0 : i32
    return %c0_i32, %c0_i32_0 : i32, i32
  }
  func.func @transform_1(%arg0: i32) -> (i32, i32) {
    %c0_i32 = arith.constant 0 : i32
    %c0_i32_0 = arith.constant 0 : i32
    %c0_i32_1 = arith.constant 0 : i32
    return %c0_i32, %c0_i32_0 : i32, i32
  }
  func.func @transform_2(%arg0: i32) -> (i32, i32) {
    %c0_i32 = arith.constant 0 : i32
    %c0_i32_0 = arith.constant 0 : i32
    %c0_i32_1 = arith.constant 0 : i32
    return %c0_i32, %c0_i32_0 : i32, i32
  }
  func.func @transform_3(%arg0: i32) -> (i32, i32) {
    %c0_i32 = arith.constant 0 : i32
    %c0_i32_0 = arith.constant 0 : i32
    %c0_i32_1 = arith.constant 0 : i32
    return %c0_i32, %c0_i32_0 : i32, i32
  }
  func.func @transform_4(%arg0: i32) -> (i32, i32) {
    %c0_i32 = arith.constant 0 : i32
    %c0_i32_0 = arith.constant 0 : i32
    %c0_i32_1 = arith.constant 0 : i32
    return %c0_i32, %c0_i32_0 : i32, i32
  }
  func.func @transform_5(%arg0: i32) -> (i32, i32) {
    %c0_i32 = arith.constant 0 : i32
    %c0_i32_0 = arith.constant 0 : i32
    %c0_i32_1 = arith.constant 0 : i32
    return %c0_i32, %c0_i32_0 : i32, i32
  }
  func.func @transform_6(%arg0: i32) -> (i32, i32) {
    %c0_i32 = arith.constant 0 : i32
    %c0_i32_0 = arith.constant 0 : i32
    %c0_i32_1 = arith.constant 0 : i32
    return %c0_i32, %c0_i32_0 : i32, i32
  }
}

</mosaic_0001>

<bundles_post_ra>
// kernel: tpu_custom_call.1
= control target key start
LH: loop header
LB: loop body
LE: loop exit
PB: predicated region body
PF: predicated region fallthrough
CT: control target
= control target key end

     0   :  { %12 = vsyncpa [#allocation5], 0  ;;  %s4278_s0 = inlined_call_operand.vmem [shape: f32[64,8], index: 0, kind: input, shape index: {}]   ;;  %s4279_s1 = inlined_call_operand.vmem [shape: f32[40,32], index: 1, kind: input, shape index: {}]   ;;  %s4280_s2 = inlined_call_operand.hbm [shape: f32[168,512], index: 2, kind: input, shape index: {}]   ;;  %s4281_s3 = inlined_call_operand.vmem [shape: f32[136,128], index: 3, kind: input, shape index: {}]   ;;  %s4282_s4 = inlined_call_operand.hbm [shape: f32[64,128], index: 4, kind: output, shape index: {0}]   ;;  %s4283_s5 = inlined_call_operand.hbm [shape: f32[8,128], index: 5, kind: output, shape index: {1}]   ;;  %s4284_s6 = inlined_call_operand.hbm [shape: f32[8,128], index: 6, kind: output, shape index: {2}]  }
   0x1   :  { %13 = vsyncpa [#allocation6], 0 }
   0x2   :  { %14 = vsyncpa [#allocation9], 0  ;;  %s2990_s21 = smov [#allocation4]  }
   0x3   :  { %s24_s22 = sshll.u32 %s2990_s21, 4  ;;  %s25_s22 = int_to_ptr.vmem [resolvable:$true] %s24_s22 }
   0x4   :  { %s2912_s23 = scalar_lea.vmem %s25_s22, 10752  ;;  %p2917_p1 = scmp.lt.s32.totalorder %s25_s22, %s25_s22 }
   0x5   :  { %p2913_p0 = scmp.ne.s32.totalorder %s25_s22, %s2912_s23  ;;  %p2918_p2 = scmp.lt.s32.totalorder %s2912_s23, %s2912_s23 }
   0x7   :  { %p2919_p3 = por %p2918_p2, %p2917_p1 }
   0x9   :  { %p2920_p4 = pnand %p2919_p3, %p2913_p0 }
   0xb   :  { %2923 = shalt.err (!%p2920_p4)
}
   0xc   :  { %s2991_s24 = smov 512   ;;  %s2992_s25 = smov 32  }
   0xd   :  { %30 = dma.hbm_to_vmem [thread:$0]  %s4280_s2, 10752, %s25_s22, [#allocation5], %s2991_s24, %s2991_s24, %s2992_s25  }
   0xe   :  { %2984 = dma.done.wait [#allocation5], 10752  }
   0xf   :  { %2985 = vsyncadd [#allocation5], 4294956544  ;;  %vm45_vm0 = vcmask 64512   ;;  %v44_v0 = vld [vmem:[%s4279_s1] sm:$0xff]  ;;  %v3048_v2 = vld [vmem:[%s4278_s0 + $0x8] sm:$0xff]  ;;  %v4287_v15 = vmov 0.0  }
  0x10   :  { %v3043_v1 = vld [vmem:[%s4278_s0] sm:$0xff]  ;;  %2623 = vmatprep.subr.mxu1 %v44_v0  ;;  %v3055_v3 = vld [vmem:[%s4278_s0 + $0x10] sm:$0xff]  ;;  %v185_v5 = vld [vmem:[%s4279_s1 + $0x18] sm:$0xff]  ;;  %409 = vmatprep.mubr.f32.mxu0 %v4287_v15  ;;  %vm187_vm1 = vcmask 261120  }
  0x11   :  { %2625 = vmatprep.mubr.msk.f32.mxu1 %vm45_vm0, %v3043_v1  ;;  %2624 = vmatpush3.msra.mxu1 %v44_v0  ;;  %v186_v4 = vld [vmem:[%s4279_s1 + $0x20] sm:$0xff]  ;;  %v3070_v6 = vld [vmem:[%s4278_s0 + $0x18] sm:$0xff]  ;;  %v184_v8 = vld [vmem:[%s4279_s1 + $0x10] sm:$0xff] }
  0x12   :  { %2626 = vmatmul.mubr.msk.f32.vlgmr.msra.gmra.mxu1 %vm45_vm0, %v3048_v2  ;;  %2637 = vmatprep.subr.mxu1 %v186_v4  ;;  %v3075_v7 = vld [vmem:[%s4278_s0 + $0x20] sm:$0xff]  ;;  %v3087_v9 = vld [vmem:[%s4278_s0 + $0x28] sm:$0xff]  ;;  %v3092_v10 = vld [vmem:[%s4278_s0 + $0x30] sm:$0xff] }
  0x13   :  { %2628 = vmatprep.mubr.msk.f32.mxu1 %vm45_vm0, %v3055_v3  ;;  %2638 = vmatpush3.msra.mxu1 %v186_v4  ;;  %v3101_v11 = vld [vmem:[%s4278_s0 + $0x38] sm:$0xff]  ;;  %v183_v12 = vld [vmem:[%s4279_s1 + $0x8] sm:$0xff]  ;;  %v341_v14 = vld [vmem:[#allocation4] sm:$0xff] }
  0x14   :  { %2639 = vmatprep.subr.mxu1 %v185_v5  ;;  %v342_v13 = vld [vmem:[#allocation4 + $0x8] sm:$0xff]  ;;  %v337_v17 = vld [vmem:[#allocation4 + $0x80] sm:$0xff]  ;;  %v344_v29 = vld [vmem:[#allocation4 + $0x18] sm:$0xff] }
  0x15   :  { %2640 = vmatpush3.msra.mxu1 %v185_v5  ;;  %375 = vmatprep.subr.mxu0 %v342_v13  ;;  %v338_v16 = vld [vmem:[#allocation4 + $0x88] sm:$0xff]  ;;  %v333_v19 = vld [vmem:[#allocation4 + $0x60] sm:$0xff]  ;;  %v343_v41 = vld [vmem:[#allocation4 + $0x10] sm:$0xff] }
  0x16   :  { %2629 = vmatmul.mubr.msk.f32.gmra.mxu1 %vm45_vm0, %v3070_v6  ;;  %2641 = vmatprep.subr.mxu1 %v184_v8  ;;  %v334_v18 = vld [vmem:[#allocation4 + $0x68] sm:$0xff]  ;;  %v329_v21 = vld [vmem:[#allocation4 + $0x40] sm:$0xff]  ;;  %v340_v42 = vld [vmem:[#allocation4 + $0x98] sm:$0xff] }
  0x17   :  { %2631 = vmatprep.mubr.msk.f32.mxu1 %vm45_vm0, %v3075_v7  ;;  %2642 = vmatpush3.msra.mxu1 %v184_v8  ;;  %v330_v20 = vld [vmem:[#allocation4 + $0x48] sm:$0xff]  ;;  %v325_v23 = vld [vmem:[#allocation4 + $0x20] sm:$0xff]  ;;  %v339_v43 = vld [vmem:[#allocation4 + $0x90] sm:$0xff] }
  0x18   :  { %2643 = vmatprep.subr.mxu1 %v183_v12  ;;  %376 = vmatpush1.msra.mxu0 %v341_v14  ;;  %v326_v22 = vld [vmem:[#allocation4 + $0x28] sm:$0xff]  ;;  %v336_v44 = vld [vmem:[#allocation4 + $0x78] sm:$0xff]  ;;  %v335_v45 = vld [vmem:[#allocation4 + $0x70] sm:$0xff] }
  0x19   :  { %2644 = vmatpush3.msra.mxu1 %v183_v12  ;;  %2521 = vmatmul.mubr.msk.f32.vlgmr.msra.gmra.mxu0 %vm45_vm0, %v3043_v1  ;;  %v332_v46 = vld [vmem:[#allocation4 + $0x58] sm:$0xff]  ;;  %v331_v47 = vld [vmem:[#allocation4 + $0x50] sm:$0xff]  ;;  %v3166_v50 = vld [vmem:[#allocation4 + $0x288] sm:$0xff] }
  0x1a   :  { %2632 = vmatmul.mubr.msk.f32.gmra.mxu1 %vm45_vm0, %v3087_v9  ;;  %2701 = vmatprep.subr.mxu1 %v342_v13  ;;  %v328_v48 = vld [vmem:[#allocation4 + $0x38] sm:$0xff]  ;;  %v327_v49 = vld [vmem:[#allocation4 + $0x30] sm:$0xff]  ;;  %4392 = vst [vmem:[#allocation14_spill] sm:$0xff] %v3166_v50  ;;  %v3172_v55 = vld [vmem:[#allocation4 + $0x280] sm:$0xff] }
  0x1b   :  { %2634 = vmatprep.mubr.msk.f32.mxu1 %vm45_vm0, %v3092_v10  ;;  %415 = vmatprep.mubr.f32.mxu0 %v4287_v15  ;;  %v3168_v51 = vld [vmem:[#allocation4 + $0x298] sm:$0xff]  ;;  %v3174_v56 = vld [vmem:[#allocation4 + $0x290] sm:$0xff]  ;;  %v3176_v57 = vld [vmem:[#allocation4 + $0x268] sm:$0xff] }
  0x1c   :  { %619 = vmatprep.subr.mxu0 %v338_v16  ;;  %4393 = vst [vmem:[#allocation15_spill] sm:$0xff] %v3168_v51  ;;  %v3178_v58 = vld [vmem:[#allocation4 + $0x278] sm:$0xff]  ;;  %v3182_v59 = vld [vmem:[#allocation4 + $0x260] sm:$0xff]  ;;  %v3186_v60 = vld [vmem:[#allocation4 + $0x248] sm:$0xff] }
  0x1d   :  { %2522 = vmatmul.mubr.msk.f32.gmra.mxu0 %vm45_vm0, %v3048_v2  ;;  %v3190_v62 = vld [vmem:[#allocation4 + $0x270] sm:$0xff]  ;;  %v3194_v0 = vld [vmem:[#allocation4 + $0x240] sm:$0xff]  ;;  %v3228_v12 = vld [vmem:[#allocation4 + $0x1e8] sm:$0xff] }
  0x1e   :  { %2635 = vmatmul.mubr.msk.f32.gmra.mxu1 %vm45_vm0, %v3101_v11  ;;  %421 = vmatprep.mubr.f32.mxu0 %v4287_v15  ;;  %v3206_v4 = vld [vmem:[#allocation4 + $0x220] sm:$0xff]  ;;  %v3218_v8 = vld [vmem:[#allocation4 + $0x230] sm:$0xff]  ;;  %v3238_v16 = vld [vmem:[#allocation4 + $0x1f8] sm:$0xff] }
  0x1f   :  { %620 = vmatpush1.msra.mxu0 %v337_v17  ;;  %v3232_v13 = vld [vmem:[#allocation4 + $0x210] sm:$0xff]  ;;  %v3242_v17 = vld [vmem:[#allocation4 + $0x1c8] sm:$0xff] }
  0x20   :  { %621 = vmatprep.subr.mxu0 %v334_v18 }
  0x21   :  { %2523 = vmatmul.mubr.msk.f32.gmra.mxu0 %vm45_vm0, %v3055_v3 }
  0x22   :  { %427 = vmatprep.mubr.f32.mxu0 %v4287_v15  ;;  %622 = vmatpush1.msra.mxu0 %v333_v19  ;;  %v3246_v19 = vld [vmem:[#allocation4 + $0x1f0] sm:$0xff] }
  0x23   :  { %623 = vmatprep.subr.mxu0 %v330_v20 }
  0x24   :  { %624 = vmatpush1.msra.mxu0 %v329_v21  ;;  %v3250_v21 = vld [vmem:[#allocation4 + $0x1c0] sm:$0xff] }
  0x25   :  { %2524 = vmatmul.mubr.msk.f32.gmra.mxu0 %vm45_vm0, %v3070_v6  ;;  %625 = vmatprep.subr.mxu0 %v326_v22  ;;  %v3254_v22 = vld [vmem:[#allocation4 + $0x1d8] sm:$0xff] }
  0x26   :  { %433 = vmatprep.mubr.f32.mxu0 %v4287_v15  ;;  %626 = vmatpush1.msra.mxu0 %v325_v23  ;;  %v3256_v23 = vld [vmem:[#allocation4 + $0x1a8] sm:$0xff] }
  0x27   :  { %921 = vmatprep.subr.mxu0 %v3166_v50 }
  0x29   :  { %2525 = vmatmul.mubr.msk.f32.gmra.mxu0 %vm45_vm0, %v3075_v7 }
  0x2a   :  { %439 = vmatprep.mubr.f32.mxu0 %v4287_v15 }
  0x2d   :  { %2526 = vmatmul.mubr.msk.f32.gmra.mxu0 %vm45_vm0, %v3087_v9 }
  0x2e   :  { %445 = vmatprep.mubr.f32.mxu0 %v4287_v15 }
  0x31   :  { %2527 = vmatmul.mubr.msk.f32.gmra.mxu0 %vm45_vm0, %v3092_v10 }
  0x32   :  { %659 = vmatprep.mubr.f32.mxu0 %v4287_v15 }
  0xd2   :  { %v2627_v24 = vpop.f32.mrf.mxu1 }
  0xd3   :  { %v176_v27 = vmax.f32 %v2627_v24, 0.0  ;;  %v3260_v24 = vld [vmem:[#allocation4 + $0x1d0] sm:$0xff] }
  0xd4   :  { %v136_v25 = vpop.f32.mrf.mxu1 }
  0xd5   :  { %v175_v26 = vmax.f32 %v136_v25, 0.0  ;;  %v3262_v25 = vld [vmem:[#allocation4 + $0x1a0] sm:$0xff] }
  0xd6   :  { %v2630_v28 = vpop.f32.mrf.mxu1 }
  0xd7   :  { %2645 = vmatprep.mubr.msk.f32.mxu1 %vm187_vm1, %v175_v26  ;;  %v178_v30 = vmax.f32 %v2630_v28, 0.0  ;;  %v3270_v28 = vld [vmem:[#allocation4 + $0x188] sm:$0xff] }
  0xd8   :  { %v146_v31 = vpop.f32.mrf.mxu1  ;;  %2646 = vmatmul.mubr.msk.f32.vlgmr.msra.gmra.mxu1 %vm187_vm1, %v176_v27  ;;  %v3266_v27 = vld [vmem:[#allocation4 + $0x1b8] sm:$0xff] }
  0xd9   :  { %v177_v32 = vmax.f32 %v146_v31, 0.0  ;;  %2702 = vmatpush1.msra.mxu1 %v341_v14  ;;  %v3234_v14 = vld [vmem:[#allocation4 + $0x1e0] sm:$0xff] }
  0xda   :  { %v2633_v33 = vpop.f32.mrf.mxu1  ;;  %488 = vmatprep.subr.mxu1 %v344_v29  ;;  %v3274_v29 = vld [vmem:[#allocation4 + $0x1b0] sm:$0xff]  ;;  %v3278_v31 = vld [vmem:[#allocation4 + $0x180] sm:$0xff] }
  0xdb   :  { %2648 = vmatprep.mubr.msk.f32.mxu1 %vm187_vm1, %v177_v32  ;;  %v180_v34 = vmax.f32 %v2633_v33, 0.0  ;;  %v3282_v32 = vld [vmem:[#allocation4 + $0x198] sm:$0xff]  ;;  %v3284_v33 = vld [vmem:[#allocation4 + $0x168] sm:$0xff] }
  0xdc   :  { %2649 = vmatmul.mubr.msk.f32.gmra.mxu1 %vm187_vm1, %v178_v30  ;;  %v156_v35 = vpop.f32.mrf.mxu1 }
  0xdd   :  { %v179_v36 = vmax.f32 %v156_v35, 0.0  ;;  %v3290_v35 = vld [vmem:[#allocation4 + $0x160] sm:$0xff] }
  0xde   :  { %v2636_v37 = vpop.f32.mrf.mxu1 }
  0xdf   :  { %2651 = vmatprep.mubr.msk.f32.mxu1 %vm187_vm1, %v179_v36  ;;  %v182_v38 = vmax.f32 %v2636_v37, 0.0  ;;  %v3294_v36 = vld [vmem:[#allocation4 + $0x178] sm:$0xff]  ;;  %v3298_v37 = vld [vmem:[#allocation4 + $0x148] sm:$0xff] }
  0xe0   :  { %2652 = vmatmul.mubr.msk.f32.gmra.mxu1 %vm187_vm1, %v180_v34  ;;  %v166_v39 = vpop.f32.mrf.mxu1  ;;  %v3288_v34 = vld [vmem:[#allocation4 + $0x190] sm:$0xff] }
  0xe1   :  { %v181_v40 = vmax.f32 %v166_v39, 0.0  ;;  %v3302_v39 = vld [vmem:[#allocation4 + $0x170] sm:$0xff] }
  0xe3   :  { %2654 = vmatprep.mubr.msk.f32.mxu1 %vm187_vm1, %v181_v40 }
  0xe4   :  { %2655 = vmatmul.mubr.msk.f32.gmra.mxu1 %vm187_vm1, %v182_v38 }
  0xe5   :  { %451 = vmatprep.mubr.f32.mxu1 %v4287_v15 }
  0xe8   :  { %2528 = vmatmul.mubr.msk.f32.vlgmr.msra.gmra.mxu1 %vm45_vm0, %v3101_v11 }
  0xe9   :  { %489 = vmatpush1.msra.mxu1 %v343_v41  ;;  %522 = vmatprep.mubr.f32.mxu1 %v4287_v15  ;;  %v3306_v41 = vld [vmem:[#allocation4 + $0x140] sm:$0xff] }
  0xea   :  { %732 = vmatprep.subr.mxu1 %v340_v42  ;;  %4394 = vst [vmem:[#allocation16_spill] sm:$0xff] %v3306_v41  ;;  %v3310_v42 = vld [vmem:[#allocation4 + $0x158] sm:$0xff] }
  0xeb   :  { %4395 = vst [vmem:[#allocation17_spill] sm:$0xff] %v3310_v42 }
  0xec   :  { %2529 = vmatmul.mubr.msk.f32.vlgmr.msra.gmra.mxu1 %vm45_vm0, %v3043_v1  ;;  %v3198_v1 = vld [vmem:[#allocation4 + $0x258] sm:$0xff] }
  0xed   :  { %528 = vmatprep.mubr.f32.mxu1 %v4287_v15  ;;  %733 = vmatpush1.msra.mxu1 %v339_v43  ;;  %v3312_v43 = vld [vmem:[#allocation4 + $0x128] sm:$0xff] }
  0xee   :  { %734 = vmatprep.subr.mxu1 %v336_v44  ;;  %4396 = vst [vmem:[#allocation18_spill] sm:$0xff] %v3312_v43  ;;  %v3316_v44 = vld [vmem:[#allocation4 + $0x150] sm:$0xff] }
  0xef   :  { %735 = vmatpush1.msra.mxu1 %v335_v45  ;;  %4397 = vst [vmem:[#allocation19_spill] sm:$0xff] %v3316_v44  ;;  %v3318_v45 = vld [vmem:[#allocation4 + $0x120] sm:$0xff] }
  0xf0   :  { %2530 = vmatmul.mubr.msk.f32.gmra.mxu1 %vm45_vm0, %v3048_v2  ;;  %736 = vmatprep.subr.mxu1 %v332_v46  ;;  %v3200_v2 = vld [vmem:[#allocation4 + $0x228] sm:$0xff]  ;;  %4398 = vst [vmem:[#allocation20_spill] sm:$0xff] %v3318_v45 }
  0xf1   :  { %534 = vmatprep.mubr.f32.mxu1 %v4287_v15  ;;  %737 = vmatpush1.msra.mxu1 %v331_v47  ;;  %v3322_v47 = vld [vmem:[#allocation4 + $0x138] sm:$0xff] }
  0xf2   :  { %738 = vmatprep.subr.mxu1 %v328_v48  ;;  %4399 = vst [vmem:[#allocation21_spill] sm:$0xff] %v3322_v47  ;;  %v3326_v48 = vld [vmem:[#allocation4 + $0x108] sm:$0xff] }
  0xf3   :  { %739 = vmatpush1.msra.mxu1 %v327_v49  ;;  %4400 = vst [vmem:[#allocation22_spill] sm:$0xff] %v3326_v48  ;;  %v3330_v49 = vld [vmem:[#allocation4 + $0x130] sm:$0xff] }
  0xf4   :  { %2531 = vmatmul.mubr.msk.f32.gmra.mxu1 %vm45_vm0, %v3055_v3  ;;  %992 = vmatprep.subr.mxu1 %v3168_v51  ;;  %v3204_v3 = vld [vmem:[#allocation4 + $0x250] sm:$0xff]  ;;  %4401 = vst [vmem:[#allocation23_spill] sm:$0xff] %v3330_v49 }
  0xf5   :  { %540 = vmatprep.mubr.f32.mxu1 %v4287_v15 }
  0xf8   :  { %2532 = vmatmul.mubr.msk.f32.gmra.mxu1 %vm45_vm0, %v3070_v6  ;;  %v3210_v6 = vld [vmem:[#allocation4 + $0x238] sm:$0xff] }
  0xf9   :  { %546 = vmatprep.mubr.f32.mxu1 %v4287_v15 }
  0xfc   :  { %2533 = vmatmul.mubr.msk.f32.gmra.mxu1 %vm45_vm0, %v3075_v7  ;;  %v3214_v7 = vld [vmem:[#allocation4 + $0x208] sm:$0xff] }
  0xfd   :  { %552 = vmatprep.mubr.f32.mxu1 %v4287_v15 }
 0x100   :  { %2534 = vmatmul.mubr.msk.f32.gmra.mxu1 %vm45_vm0, %v3087_v9 }
 0x101   :  { %558 = vmatprep.mubr.f32.mxu1 %v4287_v15 }
 0x104   :  { %2535 = vmatmul.mubr.msk.f32.gmra.mxu1 %vm45_vm0, %v3092_v10  ;;  %v3222_v10 = vld [vmem:[#allocation4 + $0x200] sm:$0xff] }
 0x105   :  { %564 = vmatprep.mubr.f32.mxu1 %v4287_v15 }
 0x108   :  { %2536 = vmatmul.mubr.msk.f32.gmra.mxu1 %vm45_vm0, %v3101_v11  ;;  %v3226_v11 = vld [vmem:[#allocation4 + $0x218] sm:$0xff] }
 0x109   :  { %772 = vmatprep.mubr.f32.mxu1 %v4287_v15 }
 0x198   :  { %v2647_v52 = vpop.f32.mrf.mxu1 }
 0x199   :  { %v318_v63 = vmax.f32 %v2647_v52, 0.0 }
 0x19a   :  { %v278_v53 = vpop.f32.mrf.mxu1 }
 0x19b   :  { %v317_v54 = vmax.f32 %v278_v53, 0.0  ;;  %v3334_v53 = vld [vmem:[#allocation4 + $0x100] sm:$0xff] }
 0x19c   :  { %v2650_v61 = vpop.f32.mrf.mxu1  ;;  %4402 = vst [vmem:[#allocation24_spill] sm:$0xff] %v3334_v53 }
 0x19d   :  { %2537 = vmatmul.mubr.msk.f32.vlgmr.msra.gmra.mxu0 %vm187_vm1, %v317_v54  ;;  %2545 = vmatmul.mubr.msk.f32.vlgmr.msra.gmra.mxu1 %vm187_vm1, %v317_v54  ;;  %v320_v20 = vmax.f32 %v2650_v61, 0.0  ;;  %v3338_v54 = vld [vmem:[#allocation4 + $0x118] sm:$0xff]  ;;  %v3340_v61 = vld [vmem:[#allocation4 + $0xe8] sm:$0xff] }
 0x19e   :  { %922 = vmatpush1.msra.mxu0 %v3172_v55  ;;  %993 = vmatpush1.msra.mxu1 %v3174_v56  ;;  %v288_v5 = vpop.f32.mrf.mxu1  ;;  %4403 = vst [vmem:[#allocation25_spill] sm:$0xff] %v3338_v54  ;;  %4404 = vst [vmem:[#allocation26_spill] sm:$0xff] %v3340_v61 }
 0x19f   :  { %923 = vmatprep.subr.mxu0 %v3176_v57  ;;  %994 = vmatprep.subr.mxu1 %v3178_v58  ;;  %v319_v9 = vmax.f32 %v288_v5, 0.0  ;;  %v3346_v5 = vld [vmem:[#allocation4 + $0xe0] sm:$0xff] }
 0x1a0   :  { %924 = vmatpush1.msra.mxu0 %v3182_v59  ;;  %665 = vmatprep.mubr.f32.mxu0 %v4287_v15  ;;  %v2653_v18 = vpop.f32.mrf.mxu1  ;;  %4406 = vst [vmem:[#allocation28_spill] sm:$0xff] %v3346_v5 }
 0x1a1   :  { %778 = vmatprep.mubr.f32.mxu1 %v4287_v15  ;;  %925 = vmatprep.subr.mxu0 %v3186_v60  ;;  %v322_v40 = vmax.f32 %v2653_v18, 0.0  ;;  %v3354_v18 = vld [vmem:[#allocation4 + $0xc8] sm:$0xff] }
 0x1a2   :  { %995 = vmatpush1.msra.mxu1 %v3190_v62  ;;  %2538 = vmatmul.mubr.msk.f32.gmra.mxu0 %vm187_vm1, %v318_v63  ;;  %v298_v26 = vpop.f32.mrf.mxu1  ;;  %4408 = vst [vmem:[#allocation30_spill] sm:$0xff] %v3354_v18 }
 0x1a3   :  { %2546 = vmatmul.mubr.msk.f32.gmra.mxu1 %vm187_vm1, %v318_v63  ;;  %926 = vmatpush1.msra.mxu0 %v3194_v0  ;;  %v321_v30 = vmax.f32 %v298_v26, 0.0  ;;  %v3344_v63 = vld [vmem:[#allocation4 + $0x110] sm:$0xff] }
 0x1a4   :  { %996 = vmatprep.subr.mxu1 %v3198_v1  ;;  %927 = vmatprep.subr.mxu0 %v3200_v2  ;;  %v2656_v38 = vpop.f32.mrf.mxu1  ;;  %4405 = vst [vmem:[#allocation27_spill] sm:$0xff] %v3344_v63 }
 0x1a5   :  { %997 = vmatpush1.msra.mxu1 %v3204_v3  ;;  %928 = vmatpush1.msra.mxu0 %v3206_v4  ;;  %v324_v26 = vmax.f32 %v2656_v38, 0.0  ;;  %v3374_v38 = vld [vmem:[#allocation4 + $0xa0] sm:$0xff] }
 0x1a6   :  { %998 = vmatprep.subr.mxu1 %v3210_v6  ;;  %671 = vmatprep.mubr.f32.mxu0 %v4287_v15  ;;  %v308_v46 = vpop.f32.mrf.mxu1  ;;  %4414 = vst [vmem:[#allocation36_spill] sm:$0xff] %v3374_v38 }
 0x1a7   :  { %784 = vmatprep.mubr.f32.mxu1 %v4287_v15  ;;  %929 = vmatprep.subr.mxu0 %v3214_v7  ;;  %v323_v52 = vmax.f32 %v308_v46, 0.0  ;;  %v3368_v46 = vld [vmem:[#allocation4 + $0xa8] sm:$0xff] }
 0x1a8   :  { %999 = vmatpush1.msra.mxu1 %v3218_v8  ;;  %2539 = vmatmul.mubr.msk.f32.gmra.mxu0 %vm187_vm1, %v319_v9  ;;  %4412 = vst [vmem:[#allocation34_spill] sm:$0xff] %v3368_v46 }
 0x1a9   :  { %2547 = vmatmul.mubr.msk.f32.gmra.mxu1 %vm187_vm1, %v319_v9  ;;  %930 = vmatpush1.msra.mxu0 %v3222_v10  ;;  %v3350_v9 = vld [vmem:[#allocation4 + $0xf8] sm:$0xff] }
 0x1aa   :  { %1000 = vmatprep.subr.mxu1 %v3226_v11  ;;  %931 = vmatprep.subr.mxu0 %v3228_v12  ;;  %4407 = vst [vmem:[#allocation29_spill] sm:$0xff] %v3350_v9 }
 0x1ab   :  { %1001 = vmatpush1.msra.mxu1 %v3232_v13  ;;  %932 = vmatpush1.msra.mxu0 %v3234_v14 }
 0x1ac   :  { %1002 = vmatprep.subr.mxu1 %v3238_v16  ;;  %677 = vmatprep.mubr.f32.mxu0 %v4287_v15 }
 0x1ad   :  { %790 = vmatprep.mubr.f32.mxu1 %v4287_v15  ;;  %933 = vmatprep.subr.mxu0 %v3242_v17 }
 0x1ae   :  { %1003 = vmatpush1.msra.mxu1 %v3246_v19  ;;  %2540 = vmatmul.mubr.msk.f32.gmra.mxu0 %vm187_vm1, %v320_v20 }
 0x1af   :  { %2548 = vmatmul.mubr.msk.f32.gmra.mxu1 %vm187_vm1, %v320_v20  ;;  %934 = vmatpush1.msra.mxu0 %v3250_v21  ;;  %v3358_v20 = vld [vmem:[#allocation4 + $0xf0] sm:$0xff] }
 0x1b0   :  { %1004 = vmatprep.subr.mxu1 %v3254_v22  ;;  %935 = vmatprep.subr.mxu0 %v3256_v23  ;;  %4409 = vst [vmem:[#allocation31_spill] sm:$0xff] %v3358_v20 }
 0x1b1   :  { %1005 = vmatpush1.msra.mxu1 %v3260_v24  ;;  %936 = vmatpush1.msra.mxu0 %v3262_v25 }
 0x1b2   :  { %1006 = vmatprep.subr.mxu1 %v3266_v27  ;;  %683 = vmatprep.mubr.f32.mxu0 %v4287_v15 }
 0x1b3   :  { %796 = vmatprep.mubr.f32.mxu1 %v4287_v15  ;;  %937 = vmatprep.subr.mxu0 %v3270_v28 }
 0x1b4   :  { %1007 = vmatpush1.msra.mxu1 %v3274_v29  ;;  %2541 = vmatmul.mubr.msk.f32.gmra.mxu0 %vm187_vm1, %v321_v30 }
 0x1b5   :  { %2549 = vmatmul.mubr.msk.f32.gmra.mxu1 %vm187_vm1, %v321_v30  ;;  %938 = vmatpush1.msra.mxu0 %v3278_v31  ;;  %v3362_v30 = vld [vmem:[#allocation4 + $0xc0] sm:$0xff] }
 0x1b6   :  { %1008 = vmatprep.subr.mxu1 %v3282_v32  ;;  %939 = vmatprep.subr.mxu0 %v3284_v33  ;;  %4410 = vst [vmem:[#allocation32_spill] sm:$0xff] %v3362_v30 }
 0x1b7   :  { %1009 = vmatpush1.msra.mxu1 %v3288_v34  ;;  %940 = vmatpush1.msra.mxu0 %v3290_v35 }
 0x1b8   :  { %1010 = vmatprep.subr.mxu1 %v3294_v36  ;;  %689 = vmatprep.mubr.f32.mxu0 %v4287_v15 }
 0x1b9   :  { %802 = vmatprep.mubr.f32.mxu1 %v4287_v15  ;;  %941 = vmatprep.subr.mxu0 %v3298_v37 }
 0x1ba   :  { %1011 = vmatpush1.msra.mxu1 %v3302_v39  ;;  %2542 = vmatmul.mubr.msk.f32.gmra.mxu0 %vm187_vm1, %v322_v40 }
 0x1bb   :  { %2550 = vmatmul.mubr.msk.f32.gmra.mxu1 %vm187_vm1, %v322_v40  ;;  %942 = vmatpush1.msra.mxu0 %v3306_v41  ;;  %v3366_v40 = vld [vmem:[#allocation4 + $0xd8] sm:$0xff] }
 0x1bc   :  { %1012 = vmatprep.subr.mxu1 %v3310_v42  ;;  %943 = vmatprep.subr.mxu0 %v3312_v43  ;;  %4411 = vst [vmem:[#allocation33_spill] sm:$0xff] %v3366_v40 }
 0x1bd   :  { %1013 = vmatpush1.msra.mxu1 %v3316_v44  ;;  %944 = vmatpush1.msra.mxu0 %v3318_v45 }
 0x1be   :  { %1014 = vmatprep.subr.mxu1 %v3322_v47  ;;  %695 = vmatprep.mubr.f32.mxu0 %v4287_v15 }
 0x1bf   :  { %808 = vmatprep.mubr.f32.mxu1 %v4287_v15  ;;  %945 = vmatprep.subr.mxu0 %v3326_v48 }
 0x1c0   :  { %1015 = vmatpush1.msra.mxu1 %v3330_v49  ;;  %2543 = vmatmul.mubr.msk.f32.gmra.mxu0 %vm187_vm1, %v323_v52 }
 0x1c1   :  { %2551 = vmatmul.mubr.msk.f32.gmra.mxu1 %vm187_vm1, %v323_v52  ;;  %946 = vmatpush1.msra.mxu0 %v3334_v53  ;;  %v3372_v52 = vld [vmem:[#allocation4 + $0xd0] sm:$0xff] }
 0x1c2   :  { %1016 = vmatprep.subr.mxu1 %v3338_v54  ;;  %947 = vmatprep.subr.mxu0 %v3340_v61  ;;  %4413 = vst [vmem:[#allocation35_spill] sm:$0xff] %v3372_v52 }
 0x1c3   :  { %1017 = vmatpush1.msra.mxu1 %v3344_v63  ;;  %948 = vmatpush1.msra.mxu0 %v3346_v5  ;;  %v3378_v5 = vld [vmem:[#allocation4 + $0xb8] sm:$0xff] }
 0x1c4   :  { %1018 = vmatprep.subr.mxu1 %v3350_v9  ;;  %701 = vmatprep.mubr.f32.mxu0 %v4287_v15  ;;  %4415 = vst [vmem:[#allocation37_spill] sm:$0xff] %v3378_v5 }
 0x1c5   :  { %814 = vmatprep.mubr.f32.mxu1 %v4287_v15  ;;  %949 = vmatprep.subr.mxu0 %v3354_v18  ;;  %v3382_v15 = vld [vmem:[#allocation4 + $0xb0] sm:$0xff]  ;;  %v4417_v18 = vmov 0.0  }
 0x1c6   :  { %1019 = vmatpush1.msra.mxu1 %v3358_v20  ;;  %2544 = vmatmul.mubr.msk.f32.gmra.mxu0 %vm187_vm1, %v324_v26  ;;  %4416 = vst [vmem:[#allocation38_spill] sm:$0xff] %v3382_v15 }
 0x1c7   :  { %2552 = vmatmul.mubr.msk.f32.gmra.mxu1 %vm187_vm1, %v324_v26  ;;  %950 = vmatpush1.msra.mxu0 %v3362_v30  ;;  %v4418_v26 = vld [vmem:[#allocation28_spill] sm:$0xff] }
 0x1c8   :  { %1020 = vmatprep.subr.mxu1 %v3366_v40  ;;  %951 = vmatprep.subr.mxu0 %v3368_v46 }
 0x1c9   :  { %1021 = vmatpush1.msra.mxu1 %v3372_v52  ;;  %952 = vmatpush1.msra.mxu0 %v3374_v38 }
 0x1ca   :  { %1022 = vmatprep.subr.mxu1 %v3378_v5  ;;  %985 = vmatprep.mubr.f32.mxu0 %v4417_v18 }
 0x1cb   :  { %1023 = vmatpush1.msra.mxu1 %v3382_v15  ;;  %1056 = vmatprep.mubr.f32.mxu1 %v4417_v18 }
 0x1cc   :  { %986 = vmatmul.mubr.f32.vlgmr.msra.gmra.mxu0 %v4417_v18  ;;  %1057 = vmatmul.mubr.f32.vlgmr.msra.gmra.mxu1 %v4417_v18 }
 0x1cd   :  { %1096 = vmatprep.subr.mxu0 %v3166_v50  ;;  %1167 = vmatprep.subr.mxu1 %v3168_v51 }
 0x1ce   :  { %1097 = vmatpush1.msra.mxu0 %v3172_v55  ;;  %1168 = vmatpush1.msra.mxu1 %v3174_v56 }
 0x1cf   :  { %1098 = vmatprep.subr.mxu0 %v3176_v57  ;;  %1169 = vmatprep.subr.mxu1 %v3178_v58 }
 0x1d0   :  { %1099 = vmatpush1.msra.mxu0 %v3182_v59  ;;  %1170 = vmatpush1.msra.mxu1 %v3190_v62 }
 0x1d1   :  { %1100 = vmatprep.subr.mxu0 %v3186_v60  ;;  %1171 = vmatprep.subr.mxu1 %v3198_v1 }
 0x1d2   :  { %1101 = vmatpush1.msra.mxu0 %v3194_v0  ;;  %1172 = vmatpush1.msra.mxu1 %v3204_v3 }
 0x1d3   :  { %1102 = vmatprep.subr.mxu0 %v3200_v2  ;;  %1173 = vmatprep.subr.mxu1 %v3210_v6 }
 0x1d4   :  { %1103 = vmatpush1.msra.mxu0 %v3206_v4  ;;  %1174 = vmatpush1.msra.mxu1 %v3218_v8 }
 0x1d5   :  { %1104 = vmatprep.subr.mxu0 %v3214_v7  ;;  %1175 = vmatprep.subr.mxu1 %v3226_v11 }
 0x1d6   :  { %1105 = vmatpush1.msra.mxu0 %v3222_v10  ;;  %1176 = vmatpush1.msra.mxu1 %v3232_v13 }
 0x1d7   :  { %1106 = vmatprep.subr.mxu0 %v3228_v12  ;;  %1177 = vmatprep.subr.mxu1 %v3238_v16 }
 0x1d8   :  { %1107 = vmatpush1.msra.mxu0 %v3234_v14  ;;  %1178 = vmatpush1.msra.mxu1 %v3246_v19 }
 0x1d9   :  { %1108 = vmatprep.subr.mxu0 %v3242_v17  ;;  %1179 = vmatprep.subr.mxu1 %v3254_v22 }
 0x1da   :  { %1109 = vmatpush1.msra.mxu0 %v3250_v21  ;;  %1180 = vmatpush1.msra.mxu1 %v3260_v24 }
 0x1db   :  { %1110 = vmatprep.subr.mxu0 %v3256_v23  ;;  %1181 = vmatprep.subr.mxu1 %v3266_v27 }
 0x1dc   :  { %1111 = vmatpush1.msra.mxu0 %v3262_v25  ;;  %1182 = vmatpush1.msra.mxu1 %v3274_v29 }
 0x1dd   :  { %1112 = vmatprep.subr.mxu0 %v3270_v28  ;;  %1183 = vmatprep.subr.mxu1 %v3282_v32 }
 0x1de   :  { %1113 = vmatpush1.msra.mxu0 %v3278_v31  ;;  %1184 = vmatpush1.msra.mxu1 %v3288_v34 }
 0x1df   :  { %1114 = vmatprep.subr.mxu0 %v3284_v33  ;;  %1185 = vmatprep.subr.mxu1 %v3294_v36 }
 0x1e0   :  { %1115 = vmatpush1.msra.mxu0 %v3290_v35  ;;  %1186 = vmatpush1.msra.mxu1 %v3302_v39 }
 0x1e1   :  { %1116 = vmatprep.subr.mxu0 %v3298_v37  ;;  %1187 = vmatprep.subr.mxu1 %v3310_v42 }
 0x1e2   :  { %1117 = vmatpush1.msra.mxu0 %v3306_v41  ;;  %1188 = vmatpush1.msra.mxu1 %v3316_v44 }
 0x1e3   :  { %1118 = vmatprep.subr.mxu0 %v3312_v43  ;;  %1189 = vmatprep.subr.mxu1 %v3322_v47  ;;  %v4419_v47 = vld [vmem:[#allocation30_spill] sm:$0xff] }
 0x1e4   :  { %1119 = vmatpush1.msra.mxu0 %v3318_v45  ;;  %1190 = vmatpush1.msra.mxu1 %v3330_v49 }
 0x1e5   :  { %1120 = vmatprep.subr.mxu0 %v3326_v48  ;;  %1191 = vmatprep.subr.mxu1 %v3338_v54 }
 0x1e6   :  { %1121 = vmatpush1.msra.mxu0 %v3334_v53  ;;  %1192 = vmatpush1.msra.mxu1 %v3344_v63 }
 0x1e7   :  { %1122 = vmatprep.subr.mxu0 %v3340_v61  ;;  %1193 = vmatprep.subr.mxu1 %v3350_v9 }
 0x1e8   :  { %1123 = vmatpush1.msra.mxu0 %v4418_v26  ;;  %1194 = vmatpush1.msra.mxu1 %v3358_v20 }
 0x1e9   :  { %1124 = vmatprep.subr.mxu0 %v4419_v47  ;;  %1195 = vmatprep.subr.mxu1 %v3366_v40  ;;  %v3460_v40 = vpop.f32.mrf.mxu1 }
 0x1ea   :  { %1125 = vmatpush1.msra.mxu0 %v3362_v30  ;;  %1196 = vmatpush1.msra.mxu1 %v3372_v52  ;;  %4420 = vst [vmem:[#allocation39_spill] sm:$0xff] %v3460_v40 }
 0x1eb   :  { %1126 = vmatprep.subr.mxu0 %v3368_v46  ;;  %1197 = vmatprep.subr.mxu1 %v3378_v5  ;;  %v3462_v30 = vpop.f32.mrf.mxu1 }
 0x1ec   :  { %1127 = vmatpush1.msra.mxu0 %v3374_v38  ;;  %1160 = vmatprep.mubr.f32.mxu0 %v4417_v18  ;;  %4421 = vst [vmem:[#allocation40_spill] sm:$0xff] %v3462_v30  ;;  %v411_v38 = vpop.f32.mrf.mxu0 }
 0x1ed   :  { %1198 = vmatpush1.msra.mxu1 %v3382_v15  ;;  %1231 = vmatprep.mubr.f32.mxu1 %v4417_v18  ;;  %v3464_v52 = vpop.f32.mrf.mxu1 }
 0x1ee   :  { %1271 = vmatprep.subr.mxu0 %v3166_v50  ;;  %1342 = vmatprep.subr.mxu1 %v3168_v51  ;;  %v413_v15 = vpop.f32.mrf.mxu0 }
 0x1ef   :  { %v3466_v46 = vpop.f32.mrf.mxu1 }
 0x1f0   :  { %v3474_v18 = vpop.f32.mrf.mxu0 }
 0x1f1   :  { %v3468_v5 = vpop.f32.mrf.mxu1  ;;  %4425 = vst [vmem:[#allocation44_spill] sm:$0xff] %v3474_v18 }
 0x1f2   :  { %4422 = vst [vmem:[#allocation41_spill] sm:$0xff] %v3468_v5  ;;  %v3478_v51 = vpop.f32.mrf.mxu0 }
 0x1f3   :  { %v3470_v47 = vpop.f32.mrf.mxu1  ;;  %4427 = vst [vmem:[#allocation46_spill] sm:$0xff] %v3478_v51 }
 0x1f4   :  { %4423 = vst [vmem:[#allocation42_spill] sm:$0xff] %v3470_v47  ;;  %v3482_v30 = vpop.f32.mrf.mxu0 }
 0x1f5   :  { %v3472_v20 = vpop.f32.mrf.mxu1  ;;  %4429 = vst [vmem:[#allocation48_spill] sm:$0xff] %v3482_v30 }
 0x1f6   :  { %4424 = vst [vmem:[#allocation43_spill] sm:$0xff] %v3472_v20  ;;  %v3486_v9 = vpop.f32.mrf.mxu0 }
 0x1f7   :  { %v3476_v50 = vpop.f32.mrf.mxu1  ;;  %4431 = vst [vmem:[#allocation50_spill] sm:$0xff] %v3486_v9 }
 0x1f8   :  { %4426 = vst [vmem:[#allocation45_spill] sm:$0xff] %v3476_v50  ;;  %v3490_v47 = vpop.f32.mrf.mxu0 }
 0x1f9   :  { %v3480_v40 = vpop.f32.mrf.mxu1  ;;  %4433 = vst [vmem:[#allocation52_spill] sm:$0xff] %v3490_v47 }
 0x1fa   :  { %4428 = vst [vmem:[#allocation47_spill] sm:$0xff] %v3480_v40  ;;  %v3494_v20 = vpop.f32.mrf.mxu0 }
 0x1fb   :  { %v3484_v26 = vpop.f32.mrf.mxu1  ;;  %4435 = vst [vmem:[#allocation54_spill] sm:$0xff] %v3494_v20 }
 0x1fc   :  { %4430 = vst [vmem:[#allocation49_spill] sm:$0xff] %v3484_v26  ;;  %v3498_v50 = vpop.f32.mrf.mxu0 }
 0x1fd   :  { %v3488_v5 = vpop.f32.mrf.mxu1  ;;  %4437 = vst [vmem:[#allocation56_spill] sm:$0xff] %v3498_v50 }
 0x1fe   :  { %4432 = vst [vmem:[#allocation51_spill] sm:$0xff] %v3488_v5  ;;  %v3502_v40 = vpop.f32.mrf.mxu0 }
 0x1ff   :  { %v3492_v61 = vpop.f32.mrf.mxu1  ;;  %4439 = vst [vmem:[#allocation58_spill] sm:$0xff] %v3502_v40 }
 0x200   :  { %4434 = vst [vmem:[#allocation53_spill] sm:$0xff] %v3492_v61  ;;  %v3506_v26 = vpop.f32.mrf.mxu0 }
 0x201   :  { %v3496_v18 = vpop.f32.mrf.mxu1  ;;  %4441 = vst [vmem:[#allocation60_spill] sm:$0xff] %v3506_v26 }
 0x202   :  { %4436 = vst [vmem:[#allocation55_spill] sm:$0xff] %v3496_v18  ;;  %v3510_v5 = vpop.f32.mrf.mxu0 }
 0x203   :  { %v3500_v51 = vpop.f32.mrf.mxu1  ;;  %4443 = vst [vmem:[#allocation62_spill] sm:$0xff] %v3510_v5 }
 0x204   :  { %4438 = vst [vmem:[#allocation57_spill] sm:$0xff] %v3500_v51  ;;  %v3514_v61 = vpop.f32.mrf.mxu0 }
 0x205   :  { %v3504_v30 = vpop.f32.mrf.mxu1  ;;  %4445 = vst [vmem:[#allocation64_spill] sm:$0xff] %v3514_v61 }
 0x206   :  { %4440 = vst [vmem:[#allocation59_spill] sm:$0xff] %v3504_v30  ;;  %v449_v18 = vpop.f32.mrf.mxu0 }
 0x207   :  { %v3508_v9 = vpop.f32.mrf.mxu1 }
 0x208   :  { %4442 = vst [vmem:[#allocation61_spill] sm:$0xff] %v3508_v9 }
 0x209   :  { %v3512_v47 = vpop.f32.mrf.mxu1 }
 0x20a   :  { %4444 = vst [vmem:[#allocation63_spill] sm:$0xff] %v3512_v47 }
 0x20b   :  { %v568_v20 = vpop.f32.mrf.mxu1 }
 0x25d   :  { %v661_v63 = vpop.f32.mrf.mxu0  ;;  %v774_v50 = vpop.f32.mrf.mxu1 }
 0x25f   :  { %v663_v53 = vpop.f32.mrf.mxu0  ;;  %v776_v51 = vpop.f32.mrf.mxu1 }
 0x260   :  { %v664_v44 = vadd.f32 %v663_v53, %v413_v15 }
 0x262   :  { %v3516_v54 = vpop.f32.mrf.mxu0 }
 0x263   :  { %4446 = vst [vmem:[#allocation65_spill] sm:$0xff] %v3516_v54  ;;  %v3518_v40 = vpop.f32.mrf.mxu1 }
 0x264   :  { %4447 = vst [vmem:[#allocation66_spill] sm:$0xff] %v3518_v40  ;;  %v3520_v30 = vpop.f32.mrf.mxu0 }
 0x265   :  { %4448 = vst [vmem:[#allocation67_spill] sm:$0xff] %v3520_v30  ;;  %v3522_v26 = vpop.f32.mrf.mxu1 }
 0x266   :  { %4449 = vst [vmem:[#allocation68_spill] sm:$0xff] %v3522_v26 }
 0x268   :  { %v3524_v9 = vpop.f32.mrf.mxu0 }
 0x269   :  { %4450 = vst [vmem:[#allocation69_spill] sm:$0xff] %v3524_v9  ;;  %v3526_v5 = vpop.f32.mrf.mxu1 }
 0x26a   :  { %4451 = vst [vmem:[#allocation70_spill] sm:$0xff] %v3526_v5  ;;  %v3528_v47 = vpop.f32.mrf.mxu0 }
 0x26b   :  { %4452 = vst [vmem:[#allocation71_spill] sm:$0xff] %v3528_v47  ;;  %v3530_v61 = vpop.f32.mrf.mxu1 }
 0x26c   :  { %4453 = vst [vmem:[#allocation72_spill] sm:$0xff] %v3530_v61 }
 0x26e   :  { %v3532_v48 = vpop.f32.mrf.mxu0 }
 0x26f   :  { %4454 = vst [vmem:[#allocation73_spill] sm:$0xff] %v3532_v48  ;;  %v3534_v49 = vpop.f32.mrf.mxu1 }
 0x270   :  { %4455 = vst [vmem:[#allocation74_spill] sm:$0xff] %v3534_v49  ;;  %v3536_v45 = vpop.f32.mrf.mxu0 }
 0x271   :  { %4456 = vst [vmem:[#allocation75_spill] sm:$0xff] %v3536_v45  ;;  %v3538_v54 = vpop.f32.mrf.mxu1 }
 0x272   :  { %4457 = vst [vmem:[#allocation76_spill] sm:$0xff] %v3538_v54 }
 0x274   :  { %v3540_v40 = vpop.f32.mrf.mxu0 }
 0x275   :  { %4458 = vst [vmem:[#allocation77_spill] sm:$0xff] %v3540_v40  ;;  %v3542_v30 = vpop.f32.mrf.mxu1 }
 0x276   :  { %4459 = vst [vmem:[#allocation78_spill] sm:$0xff] %v3542_v30  ;;  %v3544_v26 = vpop.f32.mrf.mxu0 }
 0x277   :  { %4460 = vst [vmem:[#allocation79_spill] sm:$0xff] %v3544_v26  ;;  %v3546_v9 = vpop.f32.mrf.mxu1 }
 0x278   :  { %4461 = vst [vmem:[#allocation80_spill] sm:$0xff] %v3546_v9 }
 0x27a   :  { %v3548_v5 = vpop.f32.mrf.mxu0 }
 0x27b   :  { %4462 = vst [vmem:[#allocation81_spill] sm:$0xff] %v3548_v5  ;;  %v3550_v47 = vpop.f32.mrf.mxu1 }
 0x27c   :  { %4463 = vst [vmem:[#allocation82_spill] sm:$0xff] %v3550_v47  ;;  %v3552_v61 = vpop.f32.mrf.mxu0 }
 0x27d   :  { %4464 = vst [vmem:[#allocation83_spill] sm:$0xff] %v3552_v61  ;;  %v3554_v48 = vpop.f32.mrf.mxu1  ;;  %v662_v61 = vadd.f32 %v661_v63, %v411_v38 }
 0x27e   :  { %4465 = vst [vmem:[#allocation84_spill] sm:$0xff] %v3554_v48 }
 0x280   :  { %v3556_v49 = vpop.f32.mrf.mxu0 }
 0x281   :  { %4466 = vst [vmem:[#allocation85_spill] sm:$0xff] %v3556_v49  ;;  %v3558_v45 = vpop.f32.mrf.mxu1 }
 0x282   :  { %4467 = vst [vmem:[#allocation86_spill] sm:$0xff] %v3558_v45  ;;  %v699_v54 = vpop.f32.mrf.mxu0 }
 0x283   :  { %v3560_v40 = vadd.f32 %v699_v54, %v449_v18  ;;  %v3562_v30 = vpop.f32.mrf.mxu1 }
 0x284   :  { %4469 = vst [vmem:[#allocation88_spill] sm:$0xff] %v3562_v30 }
 0x285   :  { %4468 = vst [vmem:[#allocation87_spill] sm:$0xff] %v3560_v40 }
 0x286   :  { %v3564_v26 = vpop.f32.mrf.mxu0 }
 0x287   :  { %4470 = vst [vmem:[#allocation89_spill] sm:$0xff] %v3564_v26  ;;  %v3566_v9 = vpop.f32.mrf.mxu1  ;;  %v777_v26 = vadd.f32 %v776_v51, %v3466_v46  ;;  %v4478_v46 = vld [vmem:[#allocation18_spill] sm:$0xff] }
 0x288   :  { %4471 = vst [vmem:[#allocation90_spill] sm:$0xff] %v3566_v9  ;;  %v3568_v5 = vpop.f32.mrf.mxu0 }
 0x289   :  { %4472 = vst [vmem:[#allocation91_spill] sm:$0xff] %v3568_v5  ;;  %v818_v47 = vpop.f32.mrf.mxu1  ;;  %v775_v5 = vadd.f32 %v774_v50, %v3464_v52  ;;  %v4479_v52 = vld [vmem:[#allocation21_spill] sm:$0xff] }
 0x28a   :  { %v3570_v43 = vadd.f32 %v818_v47, %v568_v20 }
 0x28c   :  { %4473 = vst [vmem:[#allocation92_spill] sm:$0xff] %v3570_v43  ;;  %v987_v48 = vpop.f32.mrf.mxu0  ;;  %v1058_v54 = vpop.f32.mrf.mxu1  ;;  %v4497_v43 = vmov 0.0  }
 0x28d   :  { %v1063_v49 = vadd.f32 %v987_v48, %v662_v61  ;;  %v1065_v20 = vadd.f32 %v1058_v54, %v775_v5  ;;  %v4481_v54 = vld [vmem:[#allocation23_spill] sm:$0xff] }
 0x28e   :  { %v989_v41 = vpop.f32.mrf.mxu0  ;;  %v1060_v30 = vpop.f32.mrf.mxu1 }
 0x28f   :  { %v2553_v45 = vmul.f32 -1.442695, %v1063_v49  ;;  %v1064_v42 = vadd.f32 %v989_v41, %v664_v44  ;;  %v1066_v9 = vadd.f32 %v1060_v30, %v777_v26  ;;  %v4476_v30 = vld [vmem:[#allocation16_spill] sm:$0xff] }
 0x290   :  { %v4480_v26 = vld [vmem:[#allocation20_spill] sm:$0xff] }
 0x291   :  { %2712 = vpow2.f32 %v2553_v45  ;;  %v2554_v18 = vmul.f32 -1.442695, %v1064_v42  ;;  %v2555_v40 = vmul.f32 -1.442695, %v1066_v9  ;;  %v4475_v9 = vld [vmem:[#allocation17_spill] sm:$0xff] }
 0x293   :  { %2714 = vpow2.f32 %v2554_v18  ;;  %v4482_v18 = vld [vmem:[#allocation22_spill] sm:$0xff] }
 0x294   :  { %2716 = vpow2.f32 %v2555_v40  ;;  %v4477_v40 = vld [vmem:[#allocation19_spill] sm:$0xff] }
 0x29e   :  { %v2713_v47 = vpop.eup %2712 }
 0x29f   :  { %v1070_v63 = vadd.f32 1.0, %v2713_v47  ;;  %v4483_v47 = vld [vmem:[#allocation25_spill] sm:$0xff] }
 0x2a0   :  { %v2715_v38 = vpop.eup %2714 }
 0x2a1   :  { %2718 = vrcp.f32 %v1070_v63  ;;  %v1076_v15 = vadd.f32 1.0, %v2715_v38  ;;  %v2717_v41 = vpop.eup %2716  ;;  %v4485_v63 = vld [vmem:[#allocation27_spill] sm:$0xff]  ;;  %v4486_v38 = vld [vmem:[#allocation26_spill] sm:$0xff] }
 0x2a2   :  { %2720 = vtanh.f32 %v1065_v20  ;;  %v1083_v48 = vadd.f32 1.0, %v2717_v41  ;;  %v4484_v20 = vld [vmem:[#allocation24_spill] sm:$0xff] }
 0x2a3   :  { %2722 = vrcp.f32 %v1076_v15  ;;  %v4487_v15 = vld [vmem:[#allocation29_spill] sm:$0xff]  ;;  %v4488_v41 = vld [vmem:[#allocation28_spill] sm:$0xff] }
 0x2a4   :  { %2724 = vrcp.f32 %v1083_v48  ;;  %v4492_v48 = vld [vmem:[#allocation32_spill] sm:$0xff] }
 0x2ae   :  { %v2719_v44 = vpop.eup %2718 }
 0x2af   :  { %v2721_v42 = vpop.eup %2720 }
 0x2b0   :  { %v2723_v45 = vpop.eup %2722  ;;  %v1087_v51 = vmul.f32 %v2721_v42, %v2719_v44  ;;  %v4489_v44 = vld [vmem:[#allocation31_spill] sm:$0xff]  ;;  %v4490_v42 = vld [vmem:[#allocation30_spill] sm:$0xff] }
 0x2b1   :  { %v1086_v49 = vmul.f32 0.0, %v2723_v45  ;;  %v2725_v50 = vpop.eup %2724  ;;  %v4491_v45 = vld [vmem:[#allocation33_spill] sm:$0xff] }
 0x2b3   :  { %v3574_v53 = vadd.f32 %v1087_v51, %v1086_v49  ;;  %v4493_v49 = vld [vmem:[#allocation35_spill] sm:$0xff]  ;;  %v4494_v51 = vld [vmem:[#allocation34_spill] sm:$0xff] }
 0x2b5   :  { %2726 = vtanh.f32 %v3574_v53 }
 0x2c2   :  { %v2727_v61 = vpop.eup %2726 }
 0x2c3   :  { %v3577_v5 = vmul.f32 %v2727_v61, %v2725_v50  ;;  %v4495_v50 = vld [vmem:[#allocation37_spill] sm:$0xff]  ;;  %v4496_v61 = vld [vmem:[#allocation36_spill] sm:$0xff] }
 0x2c5   :  { %4474 = vst [vmem:[#allocation93_spill] sm:$0xff] %v3577_v5  ;;  %1161 = vmatmul.mubr.f32.vlgmr.msra.gmra.mxu0 %v3577_v5  ;;  %1232 = vmatmul.mubr.f32.vlgmr.msra.gmra.mxu1 %v3577_v5  ;;  %v4498_v5 = vld [vmem:[#allocation38_spill] sm:$0xff] }
 0x2c6   :  { %1272 = vmatpush1.msra.mxu0 %v3172_v55  ;;  %1343 = vmatpush1.msra.mxu1 %v3174_v56 }
 0x2c7   :  { %1273 = vmatprep.subr.mxu0 %v3176_v57  ;;  %1344 = vmatprep.subr.mxu1 %v3178_v58 }
 0x2c8   :  { %1274 = vmatpush1.msra.mxu0 %v3182_v59  ;;  %1345 = vmatpush1.msra.mxu1 %v3190_v62 }
 0x2c9   :  { %1275 = vmatprep.subr.mxu0 %v3186_v60  ;;  %1346 = vmatprep.subr.mxu1 %v3198_v1 }
 0x2ca   :  { %1276 = vmatpush1.msra.mxu0 %v3194_v0  ;;  %1347 = vmatpush1.msra.mxu1 %v3204_v3 }
 0x2cb   :  { %1277 = vmatprep.subr.mxu0 %v3200_v2  ;;  %1348 = vmatprep.subr.mxu1 %v3210_v6 }
 0x2cc   :  { %1278 = vmatpush1.msra.mxu0 %v3206_v4  ;;  %1349 = vmatpush1.msra.mxu1 %v3218_v8 }
 0x2cd   :  { %1279 = vmatprep.subr.mxu0 %v3214_v7  ;;  %1350 = vmatprep.subr.mxu1 %v3226_v11 }
 0x2ce   :  { %1280 = vmatpush1.msra.mxu0 %v3222_v10  ;;  %1351 = vmatpush1.msra.mxu1 %v3232_v13 }
 0x2cf   :  { %1281 = vmatprep.subr.mxu0 %v3228_v12  ;;  %1352 = vmatprep.subr.mxu1 %v3238_v16 }
 0x2d0   :  { %1282 = vmatpush1.msra.mxu0 %v3234_v14  ;;  %1353 = vmatpush1.msra.mxu1 %v3246_v19 }
 0x2d1   :  { %1283 = vmatprep.subr.mxu0 %v3242_v17  ;;  %1354 = vmatprep.subr.mxu1 %v3254_v22 }
 0x2d2   :  { %1284 = vmatpush1.msra.mxu0 %v3250_v21  ;;  %1355 = vmatpush1.msra.mxu1 %v3260_v24 }
 0x2d3   :  { %1285 = vmatprep.subr.mxu0 %v3256_v23  ;;  %1356 = vmatprep.subr.mxu1 %v3266_v27 }
 0x2d4   :  { %1286 = vmatpush1.msra.mxu0 %v3262_v25  ;;  %1357 = vmatpush1.msra.mxu1 %v3274_v29 }
 0x2d5   :  { %1287 = vmatprep.subr.mxu0 %v3270_v28  ;;  %1358 = vmatprep.subr.mxu1 %v3282_v32 }
 0x2d6   :  { %1288 = vmatpush1.msra.mxu0 %v3278_v31  ;;  %1359 = vmatpush1.msra.mxu1 %v3288_v34 }
 0x2d7   :  { %1289 = vmatprep.subr.mxu0 %v3284_v33  ;;  %1360 = vmatprep.subr.mxu1 %v3294_v36 }
 0x2d8   :  { %1290 = vmatpush1.msra.mxu0 %v3290_v35  ;;  %1361 = vmatpush1.msra.mxu1 %v3302_v39 }
 0x2d9   :  { %1291 = vmatprep.subr.mxu0 %v3298_v37  ;;  %1362 = vmatprep.subr.mxu1 %v4475_v9 }
 0x2da   :  { %1292 = vmatpush1.msra.mxu0 %v4476_v30  ;;  %1363 = vmatpush1.msra.mxu1 %v4477_v40 }
 0x2db   :  { %1293 = vmatprep.subr.mxu0 %v4478_v46  ;;  %1364 = vmatprep.subr.mxu1 %v4479_v52  ;;  %v4508_v52 = vld [vmem:[#allocation66_spill] sm:$0xff] }
 0x2dc   :  { %1294 = vmatpush1.msra.mxu0 %v4480_v26  ;;  %1365 = vmatpush1.msra.mxu1 %v4481_v54  ;;  %v4507_v26 = vld [vmem:[#allocation41_spill] sm:$0xff] }
 0x2dd   :  { %1295 = vmatprep.subr.mxu0 %v4482_v18  ;;  %1366 = vmatprep.subr.mxu1 %v4483_v47  ;;  %v4505_v18 = vld [vmem:[#allocation42_spill] sm:$0xff] }
 0x2de   :  { %1296 = vmatpush1.msra.mxu0 %v4484_v20  ;;  %1367 = vmatpush1.msra.mxu1 %v4485_v63 }
 0x2df   :  { %1297 = vmatprep.subr.mxu0 %v4486_v38  ;;  %1368 = vmatprep.subr.mxu1 %v4487_v15  ;;  %v4503_v15 = vld [vmem:[#allocation46_spill] sm:$0xff] }
 0x2e0   :  { %1298 = vmatpush1.msra.mxu0 %v4488_v41  ;;  %1369 = vmatpush1.msra.mxu1 %v4489_v44  ;;  %v4499_v44 = vld [vmem:[#allocation14_spill] sm:$0xff] }
 0x2e1   :  { %1299 = vmatprep.subr.mxu0 %v4490_v42  ;;  %1370 = vmatprep.subr.mxu1 %v4491_v45  ;;  %v4500_v42 = vld [vmem:[#allocation15_spill] sm:$0xff]  ;;  %v4501_v45 = vld [vmem:[#allocation44_spill] sm:$0xff] }
 0x2e2   :  { %1300 = vmatpush1.msra.mxu0 %v4492_v48  ;;  %1371 = vmatpush1.msra.mxu1 %v4493_v49  ;;  %v4502_v48 = vld [vmem:[#allocation65_spill] sm:$0xff] }
 0x2e3   :  { %1301 = vmatprep.subr.mxu0 %v4494_v51  ;;  %1372 = vmatprep.subr.mxu1 %v4495_v50  ;;  %v668_v41 = vadd.f32 %v4502_v48, %v4501_v45  ;;  %v4504_v51 = vld [vmem:[#allocation67_spill] sm:$0xff]  ;;  %v781_v45 = vadd.f32 %v4508_v52, %v4507_v26 }
 0x2e4   :  { %1302 = vmatpush1.msra.mxu0 %v4496_v61  ;;  %1335 = vmatprep.mubr.f32.mxu0 %v4497_v43  ;;  %v670_v38 = vadd.f32 %v4504_v51, %v4503_v15 }
 0x2e5   :  { %1373 = vmatpush1.msra.mxu1 %v4498_v5  ;;  %1406 = vmatprep.mubr.f32.mxu1 %v4497_v43 }
 0x2e6   :  { %1446 = vmatprep.subr.mxu0 %v4499_v44  ;;  %1517 = vmatprep.subr.mxu1 %v4500_v42  ;;  %v4506_v44 = vld [vmem:[#allocation68_spill] sm:$0xff] }
 0x2e7   :  { %v783_v54 = vadd.f32 %v4506_v44, %v4505_v18 }
 0x385   :  { %v1162_v49 = vpop.f32.mrf.mxu0  ;;  %v1233_v47 = vpop.f32.mrf.mxu1 }
 0x386   :  { %v1238_v50 = vadd.f32 %v1162_v49, %v668_v41  ;;  %v1240_v48 = vadd.f32 %v1233_v47, %v781_v45 }
 0x387   :  { %v1164_v63 = vpop.f32.mrf.mxu0  ;;  %v1235_v43 = vpop.f32.mrf.mxu1 }
 0x388   :  { %v2556_v61 = vmul.f32 -1.442695, %v1238_v50  ;;  %v1239_v20 = vadd.f32 %v1164_v63, %v670_v38  ;;  %v1241_v42 = vadd.f32 %v1235_v43, %v783_v54 }
 0x38a   :  { %2728 = vpow2.f32 %v2556_v61  ;;  %v2557_v5 = vmul.f32 -1.442695, %v1239_v20  ;;  %v2558_v46 = vmul.f32 -1.442695, %v1241_v42 }
 0x38c   :  { %2730 = vpow2.f32 %v2557_v5 }
 0x38d   :  { %2732 = vtanh.f32 %v1240_v48 }
 0x38e   :  { %2734 = vpow2.f32 %v2558_v46  ;;  %v4537_v46 = vld [vmem:[#allocation71_spill] sm:$0xff] }
 0x397   :  { %v2729_v40 = vpop.eup %2728 }
 0x398   :  { %v1245_v15 = vadd.f32 1.0, %v2729_v40 }
 0x399   :  { %v2731_v41 = vpop.eup %2730 }
 0x39a   :  { %2736 = vrcp.f32 %v1245_v15  ;;  %v1251_v63 = vadd.f32 1.0, %v2731_v41  ;;  %v2733_v20 = vpop.eup %2732  ;;  %v4538_v41 = vld [vmem:[#allocation45_spill] sm:$0xff] }
 0x39b   :  { %v2735_v5 = vpop.eup %2734 }
 0x39c   :  { %2738 = vrcp.f32 %v1251_v63  ;;  %v1258_v18 = vadd.f32 1.0, %v2735_v5  ;;  %v4539_v63 = vld [vmem:[#allocation72_spill] sm:$0xff] }
 0x39e   :  { %2740 = vrcp.f32 %v1258_v18 }
 0x3a7   :  { %v2737_v38 = vpop.eup %2736 }
 0x3a8   :  { %v1262_v49 = vmul.f32 %v2737_v38, %v2733_v20  ;;  %v789_v20 = vadd.f32 %v4539_v63, %v4538_v41  ;;  %v4540_v38 = vld [vmem:[#allocation43_spill] sm:$0xff]  ;;  %v3752_v41 = vld [vmem:[#allocation4 + $0x290] sm:$0xff] }
 0x3a9   :  { %v2739_v51 = vpop.eup %2738  ;;  %v3758_v63 = vld [vmem:[#allocation4 + $0x278] sm:$0xff] }
 0x3aa   :  { %v1261_v43 = vmul.f32 %v2739_v51, %v3574_v53  ;;  %v4536_v53 = vld [vmem:[#allocation50_spill] sm:$0xff] }
 0x3ab   :  { %v2741_v40 = vpop.eup %2740  ;;  %v676_v47 = vadd.f32 %v4537_v46, %v4536_v53 }
 0x3ac   :  { %v3656_v54 = vadd.f32 %v1262_v49, %v1261_v43  ;;  %v4541_v49 = vld [vmem:[#allocation70_spill] sm:$0xff] }
 0x3ad   :  { %v787_v51 = vadd.f32 %v4541_v49, %v4540_v38  ;;  %v3767_v38 = vld [vmem:[#allocation4 + $0x248] sm:$0xff]  ;;  %v3770_v49 = vld [vmem:[#allocation4 + $0x258] sm:$0xff] }
 0x3ae   :  { %2742 = vtanh.f32 %v3656_v54 }
 0x3bb   :  { %v2743_v52 = vpop.eup %2742 }
 0x3bc   :  { %v3659_v26 = vmul.f32 %v2743_v52, %v2741_v40 }
 0x3be   :  { %4509 = vst [vmem:[#allocation17_spill] sm:$0xff] %v3659_v26  ;;  %1336 = vmatmul.mubr.f32.vlgmr.msra.gmra.mxu0 %v3659_v26  ;;  %1407 = vmatmul.mubr.f32.vlgmr.msra.gmra.mxu1 %v3659_v26  ;;  %v3824_v26 = vld [vmem:[#allocation4 + $0x1d0] sm:$0xff] }
 0x3bf   :  { %1447 = vmatpush1.msra.mxu0 %v3172_v55  ;;  %1518 = vmatpush1.msra.mxu1 %v3174_v56  ;;  %v4510_v55 = vld [vmem:[#allocation19_spill] sm:$0xff]  ;;  %v4511_v56 = vld [vmem:[#allocation18_spill] sm:$0xff] }
 0x3c0   :  { %1448 = vmatprep.subr.mxu0 %v3176_v57  ;;  %1519 = vmatprep.subr.mxu1 %v3178_v58  ;;  %v4512_v57 = vld [vmem:[#allocation21_spill] sm:$0xff]  ;;  %v4513_v58 = vld [vmem:[#allocation20_spill] sm:$0xff] }
 0x3c1   :  { %1449 = vmatpush1.msra.mxu0 %v3182_v59  ;;  %1520 = vmatpush1.msra.mxu1 %v3190_v62  ;;  %v4514_v59 = vld [vmem:[#allocation23_spill] sm:$0xff]  ;;  %v4516_v62 = vld [vmem:[#allocation25_spill] sm:$0xff] }
 0x3c2   :  { %1450 = vmatprep.subr.mxu0 %v3186_v60  ;;  %1521 = vmatprep.subr.mxu1 %v3198_v1  ;;  %v4515_v60 = vld [vmem:[#allocation22_spill] sm:$0xff]  ;;  %v4518_v1 = vld [vmem:[#allocation27_spill] sm:$0xff] }
 0x3c3   :  { %1451 = vmatpush1.msra.mxu0 %v3194_v0  ;;  %1522 = vmatpush1.msra.mxu1 %v3204_v3  ;;  %v4517_v0 = vld [vmem:[#allocation24_spill] sm:$0xff]  ;;  %v4520_v3 = vld [vmem:[#allocation29_spill] sm:$0xff] }
 0x3c4   :  { %1452 = vmatprep.subr.mxu0 %v3200_v2  ;;  %1523 = vmatprep.subr.mxu1 %v3210_v6  ;;  %v4519_v2 = vld [vmem:[#allocation26_spill] sm:$0xff]  ;;  %v4522_v6 = vld [vmem:[#allocation31_spill] sm:$0xff] }
 0x3c5   :  { %1453 = vmatpush1.msra.mxu0 %v3206_v4  ;;  %1524 = vmatpush1.msra.mxu1 %v3218_v8  ;;  %v4521_v4 = vld [vmem:[#allocation28_spill] sm:$0xff]  ;;  %v4524_v8 = vld [vmem:[#allocation33_spill] sm:$0xff] }
 0x3c6   :  { %1454 = vmatprep.subr.mxu0 %v3214_v7  ;;  %1525 = vmatprep.subr.mxu1 %v3226_v11  ;;  %v4523_v7 = vld [vmem:[#allocation30_spill] sm:$0xff]  ;;  %v4526_v11 = vld [vmem:[#allocation35_spill] sm:$0xff] }
 0x3c7   :  { %1455 = vmatpush1.msra.mxu0 %v3222_v10  ;;  %1526 = vmatpush1.msra.mxu1 %v3232_v13  ;;  %v4525_v10 = vld [vmem:[#allocation32_spill] sm:$0xff]  ;;  %v4528_v13 = vld [vmem:[#allocation37_spill] sm:$0xff] }
 0x3c8   :  { %1456 = vmatprep.subr.mxu0 %v3228_v12  ;;  %1527 = vmatprep.subr.mxu1 %v3238_v16  ;;  %v4527_v12 = vld [vmem:[#allocation34_spill] sm:$0xff]  ;;  %v4530_v16 = vmov 0.0  }
 0x3c9   :  { %1457 = vmatpush1.msra.mxu0 %v3234_v14  ;;  %1528 = vmatpush1.msra.mxu1 %v3246_v19  ;;  %v4529_v14 = vld [vmem:[#allocation36_spill] sm:$0xff]  ;;  %v3727_v19 = vld [vmem:[#allocation4 + $0x288] sm:$0xff] }
 0x3ca   :  { %1458 = vmatprep.subr.mxu0 %v3242_v17  ;;  %1529 = vmatprep.subr.mxu1 %v3254_v22  ;;  %v4531_v17 = vld [vmem:[#allocation38_spill] sm:$0xff]  ;;  %4532 = vst [vmem:[#allocation16_spill] sm:$0xff] %v3727_v19  ;;  %v4534_v22 = vld [vmem:[#allocation48_spill] sm:$0xff] }
 0x3cb   :  { %1459 = vmatpush1.msra.mxu0 %v3250_v21  ;;  %1530 = vmatpush1.msra.mxu1 %v3260_v24  ;;  %v3730_v21 = vld [vmem:[#allocation4 + $0x298] sm:$0xff] }
 0x3cc   :  { %1460 = vmatprep.subr.mxu0 %v3256_v23  ;;  %1531 = vmatprep.subr.mxu1 %v3266_v27  ;;  %4533 = vst [vmem:[#allocation14_spill] sm:$0xff] %v3730_v21  ;;  %v4535_v23 = vld [vmem:[#allocation69_spill] sm:$0xff] }
 0x3cd   :  { %1461 = vmatpush1.msra.mxu0 %v3262_v25  ;;  %1532 = vmatpush1.msra.mxu1 %v3274_v29  ;;  %v674_v24 = vadd.f32 %v4535_v23, %v4534_v22 }
 0x3ce   :  { %1462 = vmatprep.subr.mxu0 %v3270_v28  ;;  %1533 = vmatprep.subr.mxu1 %v3282_v32 }
 0x3cf   :  { %1463 = vmatpush1.msra.mxu0 %v3278_v31  ;;  %1534 = vmatpush1.msra.mxu1 %v3288_v34 }
 0x3d0   :  { %1464 = vmatprep.subr.mxu0 %v3284_v33  ;;  %1535 = vmatprep.subr.mxu1 %v3294_v36 }
 0x3d1   :  { %1465 = vmatpush1.msra.mxu0 %v3290_v35  ;;  %1536 = vmatpush1.msra.mxu1 %v3302_v39 }
 0x3d2   :  { %1466 = vmatprep.subr.mxu0 %v3298_v37  ;;  %1537 = vmatprep.subr.mxu1 %v4475_v9 }
 0x3d3   :  { %1467 = vmatpush1.msra.mxu0 %v4476_v30  ;;  %1538 = vmatpush1.msra.mxu1 %v4510_v55 }
 0x3d4   :  { %1468 = vmatprep.subr.mxu0 %v4511_v56  ;;  %1539 = vmatprep.subr.mxu1 %v4512_v57 }
 0x3d5   :  { %1469 = vmatpush1.msra.mxu0 %v4513_v58  ;;  %1540 = vmatpush1.msra.mxu1 %v4514_v59 }
 0x3d6   :  { %1470 = vmatprep.subr.mxu0 %v4515_v60  ;;  %1541 = vmatprep.subr.mxu1 %v4516_v62 }
 0x3d7   :  { %1471 = vmatpush1.msra.mxu0 %v4517_v0  ;;  %1542 = vmatpush1.msra.mxu1 %v4518_v1 }
 0x3d8   :  { %1472 = vmatprep.subr.mxu0 %v4519_v2  ;;  %1543 = vmatprep.subr.mxu1 %v4520_v3 }
 0x3d9   :  { %1473 = vmatpush1.msra.mxu0 %v4521_v4  ;;  %1544 = vmatpush1.msra.mxu1 %v4522_v6 }
 0x3da   :  { %1474 = vmatprep.subr.mxu0 %v4523_v7  ;;  %1545 = vmatprep.subr.mxu1 %v4524_v8 }
 0x3db   :  { %1475 = vmatpush1.msra.mxu0 %v4525_v10  ;;  %1546 = vmatpush1.msra.mxu1 %v4526_v11 }
 0x3dc   :  { %1476 = vmatprep.subr.mxu0 %v4527_v12  ;;  %1547 = vmatprep.subr.mxu1 %v4528_v13 }
 0x3dd   :  { %1477 = vmatpush1.msra.mxu0 %v4529_v14  ;;  %1510 = vmatprep.mubr.f32.mxu0 %v4530_v16 }
 0x3de   :  { %1548 = vmatpush1.msra.mxu1 %v4531_v17  ;;  %1581 = vmatprep.mubr.f32.mxu1 %v4530_v16 }
 0x3df   :  { %1621 = vmatprep.subr.mxu0 %v3727_v19  ;;  %1692 = vmatprep.subr.mxu1 %v3730_v21 }
 0x47e   :  { %v1337_v25 = vpop.f32.mrf.mxu0  ;;  %v1408_v45 = vpop.f32.mrf.mxu1 }
 0x47f   :  { %v1413_v50 = vadd.f32 %v1337_v25, %v674_v24  ;;  %v1415_v18 = vadd.f32 %v1408_v45, %v787_v51  ;;  %v3773_v51 = vld [vmem:[#allocation4 + $0x240] sm:$0xff] }
 0x480   :  { %v1339_v61 = vpop.f32.mrf.mxu0  ;;  %v1410_v15 = vpop.f32.mrf.mxu1 }
 0x481   :  { %v2559_v44 = vmul.f32 -1.442695, %v1413_v50  ;;  %v1414_v42 = vadd.f32 %v1339_v61, %v676_v47  ;;  %v1416_v5 = vadd.f32 %v1410_v15, %v789_v20  ;;  %v3749_v15 = vld [vmem:[#allocation4 + $0x280] sm:$0xff] }
 0x482   :  { %v3761_v20 = vld [vmem:[#allocation4 + $0x260] sm:$0xff] }
 0x483   :  { %2744 = vpow2.f32 %v2559_v44  ;;  %v2560_v48 = vmul.f32 -1.442695, %v1414_v42  ;;  %v2561_v43 = vmul.f32 -1.442695, %v1416_v5  ;;  %v3764_v5 = vld [vmem:[#allocation4 + $0x270] sm:$0xff] }
 0x485   :  { %2746 = vpow2.f32 %v2560_v48 }
 0x486   :  { %2748 = vtanh.f32 %v1415_v18  ;;  %v3776_v18 = vld [vmem:[#allocation4 + $0x250] sm:$0xff] }
 0x487   :  { %2750 = vpow2.f32 %v2561_v43  ;;  %v3779_v43 = vld [vmem:[#allocation4 + $0x228] sm:$0xff] }
 0x490   :  { %v2745_v40 = vpop.eup %2744 }
 0x491   :  { %v1420_v52 = vadd.f32 1.0, %v2745_v40  ;;  %v3782_v40 = vld [vmem:[#allocation4 + $0x238] sm:$0xff] }
 0x492   :  { %v2747_v22 = vpop.eup %2746 }
 0x493   :  { %2752 = vrcp.f32 %v1420_v52  ;;  %v1426_v23 = vadd.f32 1.0, %v2747_v22  ;;  %v2749_v24 = vpop.eup %2748  ;;  %v3785_v52 = vld [vmem:[#allocation4 + $0x220] sm:$0xff]  ;;  %v3788_v22 = vld [vmem:[#allocation4 + $0x230] sm:$0xff] }
 0x494   :  { %v2751_v25 = vpop.eup %2750 }
 0x495   :  { %2754 = vrcp.f32 %v1426_v23  ;;  %v1433_v50 = vadd.f32 1.0, %v2751_v25  ;;  %v3791_v23 = vld [vmem:[#allocation4 + $0x208] sm:$0xff]  ;;  %v3797_v25 = vld [vmem:[#allocation4 + $0x200] sm:$0xff] }
 0x497   :  { %2756 = vrcp.f32 %v1433_v50  ;;  %v3809_v50 = vld [vmem:[#allocation4 + $0x1e0] sm:$0xff] }
 0x498   :  { %4543 = vst [vmem:[#allocation44_spill] sm:$0xff] %v3809_v50 }
 0x4a0   :  { %v2753_v53 = vpop.eup %2752 }
 0x4a1   :  { %v1437_v46 = vmul.f32 %v2753_v53, %v2749_v24  ;;  %v3794_v24 = vld [vmem:[#allocation4 + $0x218] sm:$0xff]  ;;  %v3800_v53 = vld [vmem:[#allocation4 + $0x210] sm:$0xff] }
 0x4a2   :  { %v2755_v47 = vpop.eup %2754 }
 0x4a3   :  { %v1436_v61 = vmul.f32 %v2755_v47, %v3656_v54  ;;  %v3755_v54 = vld [vmem:[#allocation4 + $0x268] sm:$0xff]  ;;  %v3806_v47 = vld [vmem:[#allocation4 + $0x1f8] sm:$0xff] }
 0x4a4   :  { %v2757_v42 = vpop.eup %2756 }
 0x4a5   :  { %v3742_v44 = vadd.f32 %v1437_v46, %v1436_v61  ;;  %v3803_v46 = vld [vmem:[#allocation4 + $0x1e8] sm:$0xff]  ;;  %v3812_v61 = vld [vmem:[#allocation4 + $0x1f0] sm:$0xff] }
 0x4a6   :  { %4544 = vst [vmem:[#allocation65_spill] sm:$0xff] %v3812_v61 }
 0x4a7   :  { %2758 = vtanh.f32 %v3742_v44 }
 0x4b4   :  { %v2759_v45 = vpop.eup %2758 }
 0x4b5   :  { %v3745_v48 = vmul.f32 %v2759_v45, %v2757_v42  ;;  %v3815_v42 = vld [vmem:[#allocation4 + $0x1c8] sm:$0xff]  ;;  %v3818_v45 = vld [vmem:[#allocation4 + $0x1d8] sm:$0xff] }
 0x4b7   :  { %4542 = vst [vmem:[#allocation15_spill] sm:$0xff] %v3745_v48  ;;  %1511 = vmatmul.mubr.f32.vlgmr.msra.gmra.mxu0 %v3745_v48  ;;  %1582 = vmatmul.mubr.f32.vlgmr.msra.gmra.mxu1 %v3745_v48  ;;  %v3821_v48 = vld [vmem:[#allocation4 + $0x1c0] sm:$0xff] }
 0x4b8   :  { %1622 = vmatpush1.msra.mxu0 %v3749_v15  ;;  %1693 = vmatpush1.msra.mxu1 %v3752_v41 }
 0x4b9   :  { %1623 = vmatprep.subr.mxu0 %v3755_v54  ;;  %1694 = vmatprep.subr.mxu1 %v3758_v63 }
 0x4ba   :  { %1624 = vmatpush1.msra.mxu0 %v3761_v20  ;;  %1695 = vmatpush1.msra.mxu1 %v3764_v5 }
 0x4bb   :  { %1625 = vmatprep.subr.mxu0 %v3767_v38  ;;  %1696 = vmatprep.subr.mxu1 %v3770_v49 }
 0x4bc   :  { %1626 = vmatpush1.msra.mxu0 %v3773_v51  ;;  %1697 = vmatpush1.msra.mxu1 %v3776_v18 }
 0x4bd   :  { %1627 = vmatprep.subr.mxu0 %v3779_v43  ;;  %1698 = vmatprep.subr.mxu1 %v3782_v40 }
 0x4be   :  { %1628 = vmatpush1.msra.mxu0 %v3785_v52  ;;  %1699 = vmatpush1.msra.mxu1 %v3788_v22 }
 0x4bf   :  { %1629 = vmatprep.subr.mxu0 %v3791_v23  ;;  %1700 = vmatprep.subr.mxu1 %v3794_v24 }
 0x4c0   :  { %1630 = vmatpush1.msra.mxu0 %v3797_v25  ;;  %1701 = vmatpush1.msra.mxu1 %v3800_v53 }
 0x4c1   :  { %1631 = vmatprep.subr.mxu0 %v3803_v46  ;;  %1702 = vmatprep.subr.mxu1 %v3806_v47 }
 0x4c2   :  { %1632 = vmatpush1.msra.mxu0 %v3809_v50  ;;  %1703 = vmatpush1.msra.mxu1 %v3812_v61  ;;  %v3827_v50 = vld [vmem:[#allocation4 + $0x1a8] sm:$0xff]  ;;  %v3831_v61 = vld [vmem:[#allocation4 + $0x1a0] sm:$0xff] }
 0x4c3   :  { %1633 = vmatprep.subr.mxu0 %v3815_v42  ;;  %1704 = vmatprep.subr.mxu1 %v3818_v45 }
 0x4c4   :  { %1634 = vmatpush1.msra.mxu0 %v3821_v48  ;;  %1705 = vmatpush1.msra.mxu1 %v3824_v26 }
 0x4c5   :  { %1635 = vmatprep.subr.mxu0 %v3827_v50  ;;  %1706 = vmatprep.subr.mxu1 %v3266_v27  ;;  %v4545_v27 = vld [vmem:[#allocation52_spill] sm:$0xff] }
 0x4c6   :  { %1636 = vmatpush1.msra.mxu0 %v3831_v61  ;;  %1707 = vmatpush1.msra.mxu1 %v3274_v29 }
 0x4c7   :  { %1637 = vmatprep.subr.mxu0 %v3270_v28  ;;  %1708 = vmatprep.subr.mxu1 %v3282_v32  ;;  %v4546_v28 = vld [vmem:[#allocation73_spill] sm:$0xff]  ;;  %v4547_v32 = vld [vmem:[#allocation54_spill] sm:$0xff] }
 0x4c8   :  { %1638 = vmatpush1.msra.mxu0 %v3278_v31  ;;  %1709 = vmatpush1.msra.mxu1 %v3288_v34  ;;  %v680_v29 = vadd.f32 %v4546_v28, %v4545_v27 }
 0x4c9   :  { %1639 = vmatprep.subr.mxu0 %v3284_v33  ;;  %1710 = vmatprep.subr.mxu1 %v3294_v36  ;;  %v4548_v33 = vld [vmem:[#allocation75_spill] sm:$0xff] }
 0x4ca   :  { %1640 = vmatpush1.msra.mxu0 %v3290_v35  ;;  %1711 = vmatpush1.msra.mxu1 %v3302_v39  ;;  %v682_v34 = vadd.f32 %v4548_v33, %v4547_v32  ;;  %v4555_v32 = vld [vmem:[#allocation65_spill] sm:$0xff]  ;;  %v3914_v33 = vld [vmem:[#allocation4 + $0x1b8] sm:$0xff] }
 0x4cb   :  { %1641 = vmatprep.subr.mxu0 %v3298_v37  ;;  %1712 = vmatprep.subr.mxu1 %v4475_v9 }
 0x4cc   :  { %1642 = vmatpush1.msra.mxu0 %v4476_v30  ;;  %1713 = vmatpush1.msra.mxu1 %v4510_v55 }
 0x4cd   :  { %1643 = vmatprep.subr.mxu0 %v4511_v56  ;;  %1714 = vmatprep.subr.mxu1 %v4512_v57  ;;  %v4549_v56 = vld [vmem:[#allocation49_spill] sm:$0xff]  ;;  %v4550_v57 = vld [vmem:[#allocation76_spill] sm:$0xff] }
 0x4ce   :  { %1644 = vmatpush1.msra.mxu0 %v4513_v58  ;;  %1715 = vmatpush1.msra.mxu1 %v4514_v59  ;;  %v795_v58 = vadd.f32 %v4550_v57, %v4549_v56  ;;  %v3942_v56 = vld [vmem:[#allocation4 + $0x170] sm:$0xff]  ;;  %v3945_v57 = vld [vmem:[#allocation4 + $0x148] sm:$0xff] }
 0x4cf   :  { %1645 = vmatprep.subr.mxu0 %v4515_v60  ;;  %1716 = vmatprep.subr.mxu1 %v4516_v62  ;;  %v4551_v60 = vld [vmem:[#allocation47_spill] sm:$0xff]  ;;  %v4552_v62 = vld [vmem:[#allocation74_spill] sm:$0xff] }
 0x4d0   :  { %1646 = vmatpush1.msra.mxu0 %v4517_v0  ;;  %1717 = vmatpush1.msra.mxu1 %v4518_v1  ;;  %v793_v0 = vadd.f32 %v4552_v62, %v4551_v60  ;;  %v3954_v60 = vld [vmem:[#allocation4 + $0x150] sm:$0xff]  ;;  %v3957_v62 = vld [vmem:[#allocation4 + $0x128] sm:$0xff] }
 0x4d1   :  { %1647 = vmatprep.subr.mxu0 %v4519_v2  ;;  %1718 = vmatprep.subr.mxu1 %v4520_v3  ;;  %4556 = vst [vmem:[#allocation67_spill] sm:$0xff] %v3954_v60  ;;  %4557 = vst [vmem:[#allocation42_spill] sm:$0xff] %v3957_v62 }
 0x4d2   :  { %1648 = vmatpush1.msra.mxu0 %v4521_v4  ;;  %1719 = vmatpush1.msra.mxu1 %v4522_v6 }
 0x4d3   :  { %1649 = vmatprep.subr.mxu0 %v4523_v7  ;;  %1720 = vmatprep.subr.mxu1 %v4524_v8 }
 0x4d4   :  { %1650 = vmatpush1.msra.mxu0 %v4525_v10  ;;  %1721 = vmatpush1.msra.mxu1 %v4526_v11 }
 0x4d5   :  { %1651 = vmatprep.subr.mxu0 %v4527_v12  ;;  %1722 = vmatprep.subr.mxu1 %v4528_v13 }
 0x4d6   :  { %1652 = vmatpush1.msra.mxu0 %v4529_v14  ;;  %1685 = vmatprep.mubr.f32.mxu0 %v4530_v16 }
 0x4d7   :  { %1723 = vmatpush1.msra.mxu1 %v4531_v17  ;;  %1756 = vmatprep.mubr.f32.mxu1 %v4530_v16 }
 0x4d8   :  { %1796 = vmatprep.subr.mxu0 %v3727_v19  ;;  %1867 = vmatprep.subr.mxu1 %v3730_v21 }
 0x577   :  { %v1512_v31 = vpop.f32.mrf.mxu0  ;;  %v1583_v9 = vpop.f32.mrf.mxu1 }
 0x578   :  { %v1588_v35 = vadd.f32 %v1512_v31, %v680_v29  ;;  %v1590_v1 = vadd.f32 %v1583_v9, %v793_v0  ;;  %v3933_v9 = vld [vmem:[#allocation4 + $0x168] sm:$0xff]  ;;  %v3960_v0 = vld [vmem:[#allocation4 + $0x138] sm:$0xff] }
 0x579   :  { %v1514_v36 = vpop.f32.mrf.mxu0  ;;  %v1585_v55 = vpop.f32.mrf.mxu1  ;;  %4558 = vst [vmem:[#allocation68_spill] sm:$0xff] %v3960_v0 }
 0x57a   :  { %v2562_v37 = vmul.f32 -1.442695, %v1588_v35  ;;  %v1589_v39 = vadd.f32 %v1514_v36, %v682_v34  ;;  %v1591_v59 = vadd.f32 %v1585_v55, %v795_v58  ;;  %v3918_v34 = vld [vmem:[#allocation4 + $0x1b0] sm:$0xff]  ;;  %v3921_v35 = vld [vmem:[#allocation4 + $0x188] sm:$0xff]  ;;  %v3924_v36 = vld [vmem:[#allocation4 + $0x198] sm:$0xff] }
 0x57b   :  { %v3939_v55 = vld [vmem:[#allocation4 + $0x160] sm:$0xff]  ;;  %v3948_v58 = vld [vmem:[#allocation4 + $0x158] sm:$0xff] }
 0x57c   :  { %2760 = vpow2.f32 %v2562_v37  ;;  %v2563_v30 = vmul.f32 -1.442695, %v1589_v39  ;;  %v2564_v2 = vmul.f32 -1.442695, %v1591_v59  ;;  %v3927_v37 = vld [vmem:[#allocation4 + $0x180] sm:$0xff]  ;;  %v3930_v39 = vld [vmem:[#allocation4 + $0x190] sm:$0xff] }
 0x57d   :  { %v3951_v59 = vld [vmem:[#allocation4 + $0x140] sm:$0xff] }
 0x57e   :  { %2762 = vpow2.f32 %v2563_v30  ;;  %v3936_v30 = vld [vmem:[#allocation4 + $0x178] sm:$0xff] }
 0x57f   :  { %2764 = vtanh.f32 %v1590_v1  ;;  %v3963_v1 = vld [vmem:[#allocation4 + $0x120] sm:$0xff] }
 0x580   :  { %2766 = vpow2.f32 %v2564_v2  ;;  %4559 = vst [vmem:[#allocation41_spill] sm:$0xff] %v3963_v1  ;;  %v3966_v2 = vld [vmem:[#allocation4 + $0x130] sm:$0xff] }
 0x581   :  { %4560 = vst [vmem:[#allocation66_spill] sm:$0xff] %v3966_v2 }
 0x589   :  { %v2761_v3 = vpop.eup %2760 }
 0x58a   :  { %v1595_v4 = vadd.f32 1.0, %v2761_v3  ;;  %v3969_v3 = vld [vmem:[#allocation4 + $0x108] sm:$0xff] }
 0x58b   :  { %v2763_v6 = vpop.eup %2762  ;;  %4561 = vst [vmem:[#allocation19_spill] sm:$0xff] %v3969_v3 }
 0x58c   :  { %2768 = vrcp.f32 %v1595_v4  ;;  %v1601_v7 = vadd.f32 1.0, %v2763_v6  ;;  %v2765_v8 = vpop.eup %2764  ;;  %v3972_v4 = vld [vmem:[#allocation4 + $0x118] sm:$0xff]  ;;  %v3975_v6 = vld [vmem:[#allocation4 + $0x100] sm:$0xff] }
 0x58d   :  { %v2767_v10 = vpop.eup %2766  ;;  %4562 = vst [vmem:[#allocation18_spill] sm:$0xff] %v3972_v4  ;;  %4563 = vst [vmem:[#allocation21_spill] sm:$0xff] %v3975_v6 }
 0x58e   :  { %2770 = vrcp.f32 %v1601_v7  ;;  %v1608_v14 = vadd.f32 1.0, %v2767_v10  ;;  %v3978_v7 = vld [vmem:[#allocation4 + $0x110] sm:$0xff]  ;;  %v3984_v10 = vld [vmem:[#allocation4 + $0xf8] sm:$0xff] }
 0x58f   :  { %4564 = vst [vmem:[#allocation20_spill] sm:$0xff] %v3978_v7  ;;  %4566 = vst [vmem:[#allocation22_spill] sm:$0xff] %v3984_v10 }
 0x590   :  { %2772 = vrcp.f32 %v1608_v14  ;;  %v3996_v14 = vld [vmem:[#allocation4 + $0xd8] sm:$0xff] }
 0x591   :  { %4570 = vst [vmem:[#allocation26_spill] sm:$0xff] %v3996_v14 }
 0x599   :  { %v2769_v11 = vpop.eup %2768 }
 0x59a   :  { %v1612_v12 = vmul.f32 %v2769_v11, %v2765_v8  ;;  %v3981_v8 = vld [vmem:[#allocation4 + $0xe8] sm:$0xff]  ;;  %v3987_v11 = vld [vmem:[#allocation4 + $0xe0] sm:$0xff] }
 0x59b   :  { %v2771_v13 = vpop.eup %2770  ;;  %4565 = vst [vmem:[#allocation23_spill] sm:$0xff] %v3981_v8  ;;  %4567 = vst [vmem:[#allocation25_spill] sm:$0xff] %v3987_v11 }
 0x59c   :  { %v1611_v17 = vmul.f32 %v2771_v13, %v3742_v44  ;;  %v4554_v44 = vld [vmem:[#allocation44_spill] sm:$0xff]  ;;  %v3993_v13 = vld [vmem:[#allocation4 + $0xc8] sm:$0xff] }
 0x59d   :  { %v2773_v28 = vpop.eup %2772  ;;  %4569 = vst [vmem:[#allocation27_spill] sm:$0xff] %v3993_v13 }
 0x59e   :  { %v3880_v27 = vadd.f32 %v1612_v12, %v1611_v17  ;;  %v3990_v12 = vld [vmem:[#allocation4 + $0xf0] sm:$0xff]  ;;  %v3999_v17 = vld [vmem:[#allocation4 + $0xc0] sm:$0xff] }
 0x59f   :  { %4568 = vst [vmem:[#allocation24_spill] sm:$0xff] %v3990_v12  ;;  %4571 = vst [vmem:[#allocation29_spill] sm:$0xff] %v3999_v17 }
 0x5a0   :  { %2774 = vtanh.f32 %v3880_v27 }
 0x5ad   :  { %v2775_v29 = vpop.eup %2774 }
 0x5ae   :  { %v3883_v31 = vmul.f32 %v2775_v29, %v2773_v28  ;;  %v4002_v28 = vld [vmem:[#allocation4 + $0xd0] sm:$0xff]  ;;  %v4005_v29 = vld [vmem:[#allocation4 + $0xa8] sm:$0xff] }
 0x5af   :  { %4572 = vst [vmem:[#allocation28_spill] sm:$0xff] %v4002_v28  ;;  %4573 = vst [vmem:[#allocation31_spill] sm:$0xff] %v4005_v29 }
 0x5b0   :  { %4553 = vst [vmem:[#allocation46_spill] sm:$0xff] %v3883_v31  ;;  %1686 = vmatmul.mubr.f32.vlgmr.msra.gmra.mxu0 %v3883_v31  ;;  %1757 = vmatmul.mubr.f32.vlgmr.msra.gmra.mxu1 %v3883_v31  ;;  %v4008_v31 = vld [vmem:[#allocation4 + $0xb8] sm:$0xff] }
 0x5b1   :  { %1797 = vmatpush1.msra.mxu0 %v3749_v15  ;;  %1868 = vmatpush1.msra.mxu1 %v3752_v41  ;;  %4574 = vst [vmem:[#allocation30_spill] sm:$0xff] %v4008_v31 }
 0x5b2   :  { %1798 = vmatprep.subr.mxu0 %v3755_v54  ;;  %1869 = vmatprep.subr.mxu1 %v3758_v63 }
 0x5b3   :  { %1799 = vmatpush1.msra.mxu0 %v3761_v20  ;;  %1870 = vmatpush1.msra.mxu1 %v3764_v5 }
 0x5b4   :  { %1800 = vmatprep.subr.mxu0 %v3767_v38  ;;  %1871 = vmatprep.subr.mxu1 %v3770_v49 }
 0x5b5   :  { %1801 = vmatpush1.msra.mxu0 %v3773_v51  ;;  %1872 = vmatpush1.msra.mxu1 %v3776_v18 }
 0x5b6   :  { %1802 = vmatprep.subr.mxu0 %v3779_v43  ;;  %1873 = vmatprep.subr.mxu1 %v3782_v40 }
 0x5b7   :  { %1803 = vmatpush1.msra.mxu0 %v3785_v52  ;;  %1874 = vmatpush1.msra.mxu1 %v3788_v22 }
 0x5b8   :  { %1804 = vmatprep.subr.mxu0 %v3791_v23  ;;  %1875 = vmatprep.subr.mxu1 %v3794_v24 }
 0x5b9   :  { %1805 = vmatpush1.msra.mxu0 %v3797_v25  ;;  %1876 = vmatpush1.msra.mxu1 %v3800_v53 }
 0x5ba   :  { %1806 = vmatprep.subr.mxu0 %v3803_v46  ;;  %1877 = vmatprep.subr.mxu1 %v3806_v47 }
 0x5bb   :  { %1807 = vmatpush1.msra.mxu0 %v4554_v44  ;;  %1878 = vmatpush1.msra.mxu1 %v4555_v32 }
 0x5bc   :  { %1808 = vmatprep.subr.mxu0 %v3815_v42  ;;  %1879 = vmatprep.subr.mxu1 %v3818_v45 }
 0x5bd   :  { %1809 = vmatpush1.msra.mxu0 %v3821_v48  ;;  %1880 = vmatpush1.msra.mxu1 %v3824_v26 }
 0x5be   :  { %1810 = vmatprep.subr.mxu0 %v3827_v50  ;;  %1881 = vmatprep.subr.mxu1 %v3914_v33 }
 0x5bf   :  { %1811 = vmatpush1.msra.mxu0 %v3831_v61  ;;  %1882 = vmatpush1.msra.mxu1 %v3918_v34 }
 0x5c0   :  { %1812 = vmatprep.subr.mxu0 %v3921_v35  ;;  %1883 = vmatprep.subr.mxu1 %v3924_v36 }
 0x5c1   :  { %1813 = vmatpush1.msra.mxu0 %v3927_v37  ;;  %1884 = vmatpush1.msra.mxu1 %v3930_v39 }
 0x5c2   :  { %1814 = vmatprep.subr.mxu0 %v3933_v9  ;;  %1885 = vmatprep.subr.mxu1 %v3936_v30 }
 0x5c3   :  { %1815 = vmatpush1.msra.mxu0 %v3939_v55  ;;  %1886 = vmatpush1.msra.mxu1 %v3942_v56 }
 0x5c4   :  { %1816 = vmatprep.subr.mxu0 %v3945_v57  ;;  %1887 = vmatprep.subr.mxu1 %v3948_v58 }
 0x5c5   :  { %1817 = vmatpush1.msra.mxu0 %v3951_v59  ;;  %1888 = vmatpush1.msra.mxu1 %v3954_v60 }
 0x5c6   :  { %1818 = vmatprep.subr.mxu0 %v3957_v62  ;;  %1889 = vmatprep.subr.mxu1 %v3960_v0  ;;  %v4584_v0 = vld [vmem:[#allocation78_spill] sm:$0xff] }
 0x5c7   :  { %1819 = vmatpush1.msra.mxu0 %v3963_v1  ;;  %1890 = vmatpush1.msra.mxu1 %v3966_v2  ;;  %v4583_v1 = vld [vmem:[#allocation51_spill] sm:$0xff] }
 0x5c8   :  { %1820 = vmatprep.subr.mxu0 %v3969_v3  ;;  %1891 = vmatprep.subr.mxu1 %v3972_v4  ;;  %v4581_v3 = vld [vmem:[#allocation53_spill] sm:$0xff] }
 0x5c9   :  { %1821 = vmatpush1.msra.mxu0 %v3975_v6  ;;  %1892 = vmatpush1.msra.mxu1 %v3978_v7 }
 0x5ca   :  { %1822 = vmatprep.subr.mxu0 %v3981_v8  ;;  %1893 = vmatprep.subr.mxu1 %v3984_v10 }
 0x5cb   :  { %1823 = vmatpush1.msra.mxu0 %v3987_v11  ;;  %1894 = vmatpush1.msra.mxu1 %v3990_v12  ;;  %v4579_v12 = vld [vmem:[#allocation58_spill] sm:$0xff]  ;;  %v4580_v11 = vld [vmem:[#allocation79_spill] sm:$0xff] }
 0x5cc   :  { %1824 = vmatprep.subr.mxu0 %v3993_v13  ;;  %1895 = vmatprep.subr.mxu1 %v3996_v14  ;;  %v4011_v13 = vld [vmem:[#allocation4 + $0xa0] sm:$0xff]  ;;  %v4015_v14 = vld [vmem:[#allocation4 + $0xb0] sm:$0xff]  ;;  %v688_v10 = vadd.f32 %v4580_v11, %v4579_v12 }
 0x5cd   :  { %1825 = vmatpush1.msra.mxu0 %v3999_v17  ;;  %1896 = vmatpush1.msra.mxu1 %v4002_v28  ;;  %4575 = vst [vmem:[#allocation33_spill] sm:$0xff] %v4011_v13  ;;  %4576 = vst [vmem:[#allocation32_spill] sm:$0xff] %v4015_v14  ;;  %v4578_v28 = vld [vmem:[#allocation77_spill] sm:$0xff] }
 0x5ce   :  { %1826 = vmatprep.subr.mxu0 %v4005_v29  ;;  %1897 = vmatprep.subr.mxu1 %v4008_v31  ;;  %v4577_v29 = vld [vmem:[#allocation56_spill] sm:$0xff] }
 0x5cf   :  { %1827 = vmatpush1.msra.mxu0 %v4011_v13  ;;  %1860 = vmatprep.mubr.f32.mxu0 %v4530_v16  ;;  %v686_v17 = vadd.f32 %v4578_v28, %v4577_v29  ;;  %v799_v28 = vadd.f32 %v4584_v0, %v4583_v1  ;;  %v4588_v1 = vld [vmem:[#allocation68_spill] sm:$0xff] }
 0x5d0   :  { %1898 = vmatpush1.msra.mxu1 %v4015_v14  ;;  %1931 = vmatprep.mubr.f32.mxu1 %v4530_v16 }
 0x5d1   :  { %1971 = vmatprep.subr.mxu0 %v3727_v19  ;;  %2042 = vmatprep.subr.mxu1 %v3730_v21  ;;  %v4582_v19 = vld [vmem:[#allocation80_spill] sm:$0xff] }
 0x5d2   :  { %v801_v2 = vadd.f32 %v4582_v19, %v4581_v3  ;;  %v4589_v3 = vld [vmem:[#allocation41_spill] sm:$0xff] }
 0x670   :  { %v1687_v31 = vpop.f32.mrf.mxu0  ;;  %v1758_v4 = vpop.f32.mrf.mxu1 }
 0x671   :  { %v1763_v13 = vadd.f32 %v1687_v31, %v686_v17  ;;  %v1765_v29 = vadd.f32 %v1758_v4, %v799_v28  ;;  %v4590_v4 = vld [vmem:[#allocation66_spill] sm:$0xff]  ;;  %v4593_v28 = vld [vmem:[#allocation21_spill] sm:$0xff] }
 0x672   :  { %v1689_v8 = vpop.f32.mrf.mxu0  ;;  %v1760_v16 = vpop.f32.mrf.mxu1  ;;  %v4592_v17 = vld [vmem:[#allocation18_spill] sm:$0xff] }
 0x673   :  { %v2565_v7 = vmul.f32 -1.442695, %v1763_v13  ;;  %v1764_v6 = vadd.f32 %v1689_v8, %v688_v10  ;;  %v1766_v21 = vadd.f32 %v1760_v16, %v801_v2 }
 0x675   :  { %2776 = vpow2.f32 %v2565_v7  ;;  %v2566_v14 = vmul.f32 -1.442695, %v1764_v6  ;;  %v2567_v62 = vmul.f32 -1.442695, %v1766_v21 }
 0x677   :  { %2778 = vpow2.f32 %v2566_v14  ;;  %v4591_v14 = vld [vmem:[#allocation19_spill] sm:$0xff] }
 0x678   :  { %2780 = vtanh.f32 %v1765_v29  ;;  %v4594_v29 = vld [vmem:[#allocation20_spill] sm:$0xff] }
 0x679   :  { %2782 = vpow2.f32 %v2567_v62  ;;  %v4587_v62 = vld [vmem:[#allocation42_spill] sm:$0xff] }
 0x682   :  { %v2777_v60 = vpop.eup %2776 }
 0x683   :  { %v1770_v11 = vadd.f32 1.0, %v2777_v60 }
 0x684   :  { %v2779_v31 = vpop.eup %2778 }
 0x685   :  { %2784 = vrcp.f32 %v1770_v11  ;;  %v1776_v7 = vadd.f32 1.0, %v2779_v31  ;;  %v2781_v6 = vpop.eup %2780  ;;  %v4595_v11 = vld [vmem:[#allocation23_spill] sm:$0xff]  ;;  %v4596_v31 = vld [vmem:[#allocation22_spill] sm:$0xff] }
 0x686   :  { %v2783_v8 = vpop.eup %2782 }
 0x687   :  { %2786 = vrcp.f32 %v1776_v7  ;;  %v1783_v19 = vadd.f32 1.0, %v2783_v8  ;;  %v4597_v7 = vld [vmem:[#allocation25_spill] sm:$0xff]  ;;  %v4599_v8 = vld [vmem:[#allocation27_spill] sm:$0xff] }
 0x689   :  { %2788 = vrcp.f32 %v1783_v19  ;;  %v4603_v19 = vld [vmem:[#allocation31_spill] sm:$0xff] }
 0x692   :  { %v2785_v10 = vpop.eup %2784 }
 0x693   :  { %v1787_v12 = vmul.f32 %v2785_v10, %v2781_v6  ;;  %v4598_v6 = vld [vmem:[#allocation24_spill] sm:$0xff]  ;;  %v4600_v10 = vld [vmem:[#allocation26_spill] sm:$0xff] }
 0x694   :  { %v2787_v13 = vpop.eup %2786 }
 0x695   :  { %v1786_v16 = vmul.f32 %v2787_v13, %v3880_v27  ;;  %v4586_v27 = vld [vmem:[#allocation67_spill] sm:$0xff]  ;;  %v4602_v13 = vld [vmem:[#allocation28_spill] sm:$0xff] }
 0x696   :  { %v2789_v21 = vpop.eup %2788 }
 0x697   :  { %v4030_v2 = vadd.f32 %v1787_v12, %v1786_v16  ;;  %v4601_v12 = vld [vmem:[#allocation29_spill] sm:$0xff]  ;;  %v4604_v16 = vld [vmem:[#allocation30_spill] sm:$0xff] }
 0x699   :  { %2790 = vtanh.f32 %v4030_v2 }
 0x6a6   :  { %v2791_v60 = vpop.eup %2790 }
 0x6a7   :  { %v4033_v0 = vmul.f32 %v2791_v60, %v2789_v21  ;;  %v4605_v21 = vld [vmem:[#allocation33_spill] sm:$0xff]  ;;  %v4606_v60 = vmov 0.0  }
 0x6a9   :  { %4585 = vst [vmem:[#allocation35_spill] sm:$0xff] %v4033_v0  ;;  %1861 = vmatmul.mubr.f32.vlgmr.msra.gmra.mxu0 %v4033_v0  ;;  %1932 = vmatmul.mubr.f32.vlgmr.msra.gmra.mxu1 %v4033_v0  ;;  %v4607_v0 = vld [vmem:[#allocation32_spill] sm:$0xff] }
 0x6aa   :  { %1972 = vmatpush1.msra.mxu0 %v3749_v15  ;;  %2043 = vmatpush1.msra.mxu1 %v3752_v41 }
 0x6ab   :  { %1973 = vmatprep.subr.mxu0 %v3755_v54  ;;  %2044 = vmatprep.subr.mxu1 %v3758_v63 }
 0x6ac   :  { %1974 = vmatpush1.msra.mxu0 %v3761_v20  ;;  %2045 = vmatpush1.msra.mxu1 %v3764_v5 }
 0x6ad   :  { %1975 = vmatprep.subr.mxu0 %v3767_v38  ;;  %2046 = vmatprep.subr.mxu1 %v3770_v49 }
 0x6ae   :  { %1976 = vmatpush1.msra.mxu0 %v3773_v51  ;;  %2047 = vmatpush1.msra.mxu1 %v3776_v18 }
 0x6af   :  { %1977 = vmatprep.subr.mxu0 %v3779_v43  ;;  %2048 = vmatprep.subr.mxu1 %v3782_v40 }
 0x6b0   :  { %1978 = vmatpush1.msra.mxu0 %v3785_v52  ;;  %2049 = vmatpush1.msra.mxu1 %v3788_v22 }
 0x6b1   :  { %1979 = vmatprep.subr.mxu0 %v3791_v23  ;;  %2050 = vmatprep.subr.mxu1 %v3794_v24 }
 0x6b2   :  { %1980 = vmatpush1.msra.mxu0 %v3797_v25  ;;  %2051 = vmatpush1.msra.mxu1 %v3800_v53 }
 0x6b3   :  { %1981 = vmatprep.subr.mxu0 %v3803_v46  ;;  %2052 = vmatprep.subr.mxu1 %v3806_v47 }
 0x6b4   :  { %1982 = vmatpush1.msra.mxu0 %v4554_v44  ;;  %2053 = vmatpush1.msra.mxu1 %v4555_v32 }
 0x6b5   :  { %1983 = vmatprep.subr.mxu0 %v3815_v42  ;;  %2054 = vmatprep.subr.mxu1 %v3818_v45 }
 0x6b6   :  { %1984 = vmatpush1.msra.mxu0 %v3821_v48  ;;  %2055 = vmatpush1.msra.mxu1 %v3824_v26 }
 0x6b7   :  { %1985 = vmatprep.subr.mxu0 %v3827_v50  ;;  %2056 = vmatprep.subr.mxu1 %v3914_v33 }
 0x6b8   :  { %1986 = vmatpush1.msra.mxu0 %v3831_v61  ;;  %2057 = vmatpush1.msra.mxu1 %v3918_v34 }
 0x6b9   :  { %1987 = vmatprep.subr.mxu0 %v3921_v35  ;;  %2058 = vmatprep.subr.mxu1 %v3924_v36 }
 0x6ba   :  { %1988 = vmatpush1.msra.mxu0 %v3927_v37  ;;  %2059 = vmatpush1.msra.mxu1 %v3930_v39 }
 0x6bb   :  { %1989 = vmatprep.subr.mxu0 %v3933_v9  ;;  %2060 = vmatprep.subr.mxu1 %v3936_v30 }
 0x6bc   :  { %1990 = vmatpush1.msra.mxu0 %v3939_v55  ;;  %2061 = vmatpush1.msra.mxu1 %v3942_v56 }
 0x6bd   :  { %1991 = vmatprep.subr.mxu0 %v3945_v57  ;;  %2062 = vmatprep.subr.mxu1 %v3948_v58 }
 0x6be   :  { %1992 = vmatpush1.msra.mxu0 %v3951_v59  ;;  %2063 = vmatpush1.msra.mxu1 %v4586_v27 }
 0x6bf   :  { %1993 = vmatprep.subr.mxu0 %v4587_v62  ;;  %2064 = vmatprep.subr.mxu1 %v4588_v1  ;;  %v4617_v1 = vld [vmem:[#allocation82_spill] sm:$0xff] }
 0x6c0   :  { %1994 = vmatpush1.msra.mxu0 %v4589_v3  ;;  %2065 = vmatpush1.msra.mxu1 %v4590_v4  ;;  %v4616_v3 = vld [vmem:[#allocation55_spill] sm:$0xff] }
 0x6c1   :  { %1995 = vmatprep.subr.mxu0 %v4591_v14  ;;  %2066 = vmatprep.subr.mxu1 %v4592_v17  ;;  %v4614_v14 = vld [vmem:[#allocation57_spill] sm:$0xff] }
 0x6c2   :  { %1996 = vmatpush1.msra.mxu0 %v4593_v28  ;;  %2067 = vmatpush1.msra.mxu1 %v4594_v29 }
 0x6c3   :  { %1997 = vmatprep.subr.mxu0 %v4595_v11  ;;  %2068 = vmatprep.subr.mxu1 %v4596_v31  ;;  %v4612_v31 = vld [vmem:[#allocation62_spill] sm:$0xff] }
 0x6c4   :  { %1998 = vmatpush1.msra.mxu0 %v4597_v7  ;;  %2069 = vmatpush1.msra.mxu1 %v4598_v6  ;;  %v4608_v6 = vld [vmem:[#allocation16_spill] sm:$0xff] }
 0x6c5   :  { %1999 = vmatprep.subr.mxu0 %v4599_v8  ;;  %2070 = vmatprep.subr.mxu1 %v4600_v10  ;;  %v4609_v8 = vld [vmem:[#allocation14_spill] sm:$0xff]  ;;  %v4610_v10 = vld [vmem:[#allocation60_spill] sm:$0xff] }
 0x6c6   :  { %2000 = vmatpush1.msra.mxu0 %v4601_v12  ;;  %2071 = vmatpush1.msra.mxu1 %v4602_v13  ;;  %v4611_v12 = vld [vmem:[#allocation81_spill] sm:$0xff] }
 0x6c7   :  { %2001 = vmatprep.subr.mxu0 %v4603_v19  ;;  %2072 = vmatprep.subr.mxu1 %v4604_v16  ;;  %v692_v7 = vadd.f32 %v4611_v12, %v4610_v10  ;;  %v4613_v19 = vld [vmem:[#allocation83_spill] sm:$0xff]  ;;  %v805_v10 = vadd.f32 %v4617_v1, %v4616_v3 }
 0x6c8   :  { %2002 = vmatpush1.msra.mxu0 %v4605_v21  ;;  %2035 = vmatprep.mubr.f32.mxu0 %v4606_v60  ;;  %v694_v11 = vadd.f32 %v4613_v19, %v4612_v31 }
 0x6c9   :  { %2073 = vmatpush1.msra.mxu1 %v4607_v0  ;;  %2106 = vmatprep.mubr.f32.mxu1 %v4606_v60 }
 0x6ca   :  { %2146 = vmatprep.subr.mxu0 %v4608_v6  ;;  %2217 = vmatprep.subr.mxu1 %v4609_v8  ;;  %v4615_v6 = vld [vmem:[#allocation84_spill] sm:$0xff] }
 0x6cb   :  { %v807_v4 = vadd.f32 %v4615_v6, %v4614_v14 }
 0x769   :  { %v1862_v13 = vpop.f32.mrf.mxu0  ;;  %v1933_v17 = vpop.f32.mrf.mxu1 }
 0x76a   :  { %v1938_v16 = vadd.f32 %v1862_v13, %v692_v7  ;;  %v1940_v12 = vadd.f32 %v1933_v17, %v805_v10 }
 0x76b   :  { %v1864_v29 = vpop.f32.mrf.mxu0  ;;  %v1935_v60 = vpop.f32.mrf.mxu1 }
 0x76c   :  { %v2568_v21 = vmul.f32 -1.442695, %v1938_v16  ;;  %v1939_v28 = vadd.f32 %v1864_v29, %v694_v11  ;;  %v1941_v8 = vadd.f32 %v1935_v60, %v807_v4 }
 0x76e   :  { %2792 = vpow2.f32 %v2568_v21  ;;  %v2569_v0 = vmul.f32 -1.442695, %v1939_v28  ;;  %v2570_v62 = vmul.f32 -1.442695, %v1941_v8 }
 0x770   :  { %2794 = vpow2.f32 %v2569_v0 }
 0x771   :  { %2796 = vtanh.f32 %v1940_v12 }
 0x772   :  { %2798 = vpow2.f32 %v2570_v62 }
 0x77b   :  { %v2793_v27 = vpop.eup %2792 }
 0x77c   :  { %v1945_v31 = vadd.f32 1.0, %v2793_v27 }
 0x77d   :  { %v2795_v7 = vpop.eup %2794 }
 0x77e   :  { %2800 = vrcp.f32 %v1945_v31  ;;  %v1951_v29 = vadd.f32 1.0, %v2795_v7  ;;  %v2797_v28 = vpop.eup %2796 }
 0x77f   :  { %v2799_v0 = vpop.eup %2798 }
 0x780   :  { %2802 = vrcp.f32 %v1951_v29  ;;  %v1958_v14 = vadd.f32 1.0, %v2799_v0 }
 0x782   :  { %2804 = vrcp.f32 %v1958_v14 }
 0x78b   :  { %v2801_v11 = vpop.eup %2800 }
 0x78c   :  { %v1962_v13 = vmul.f32 %v2801_v11, %v2797_v28 }
 0x78d   :  { %v2803_v19 = vpop.eup %2802 }
 0x78e   :  { %v1961_v4 = vmul.f32 %v2803_v19, %v4030_v2 }
 0x78f   :  { %v2805_v27 = vpop.eup %2804 }
 0x790   :  { %v4112_v16 = vadd.f32 %v1962_v13, %v1961_v4  ;;  %v2341_v4 = vld [vmem:[%s4281_s3 + $0x70] sm:$0xff] }
 0x792   :  { %2806 = vtanh.f32 %v4112_v16 }
 0x79f   :  { %v2807_v1 = vpop.eup %2806 }
 0x7a0   :  { %v4115_v3 = vmul.f32 %v2807_v1, %v2805_v27  ;;  %v4647_v27 = vld [vmem:[#allocation93_spill] sm:$0xff]  ;;  %v2339_v1 = vld [vmem:[%s4281_s3 + $0x60] sm:$0xff] }
 0x7a2   :  { %2036 = vmatmul.mubr.f32.vlgmr.msra.gmra.mxu0 %v4115_v3  ;;  %2107 = vmatmul.mubr.f32.vlgmr.msra.gmra.mxu1 %v4115_v3 }
 0x7a3   :  { %2147 = vmatpush1.msra.mxu0 %v3749_v15  ;;  %2218 = vmatpush1.msra.mxu1 %v3752_v41  ;;  %v4620_v15 = vld [vmem:[#allocation68_spill] sm:$0xff]  ;;  %v4621_v41 = vld [vmem:[#allocation41_spill] sm:$0xff] }
 0x7a4   :  { %2148 = vmatprep.subr.mxu0 %v3755_v54  ;;  %2219 = vmatprep.subr.mxu1 %v3758_v63  ;;  %v4622_v54 = vld [vmem:[#allocation66_spill] sm:$0xff]  ;;  %v4623_v63 = vld [vmem:[#allocation19_spill] sm:$0xff] }
 0x7a5   :  { %2149 = vmatpush1.msra.mxu0 %v3761_v20  ;;  %2220 = vmatpush1.msra.mxu1 %v3764_v5  ;;  %v4624_v20 = vld [vmem:[#allocation18_spill] sm:$0xff]  ;;  %v4625_v5 = vld [vmem:[#allocation21_spill] sm:$0xff] }
 0x7a6   :  { %2150 = vmatprep.subr.mxu0 %v3767_v38  ;;  %2221 = vmatprep.subr.mxu1 %v3770_v49  ;;  %v4626_v38 = vld [vmem:[#allocation20_spill] sm:$0xff]  ;;  %v4627_v49 = vld [vmem:[#allocation23_spill] sm:$0xff] }
 0x7a7   :  { %2151 = vmatpush1.msra.mxu0 %v3773_v51  ;;  %2222 = vmatpush1.msra.mxu1 %v3776_v18  ;;  %v4628_v51 = vld [vmem:[#allocation22_spill] sm:$0xff]  ;;  %v4629_v18 = vld [vmem:[#allocation25_spill] sm:$0xff] }
 0x7a8   :  { %2152 = vmatprep.subr.mxu0 %v3779_v43  ;;  %2223 = vmatprep.subr.mxu1 %v3782_v40  ;;  %v4630_v43 = vld [vmem:[#allocation24_spill] sm:$0xff]  ;;  %v4631_v40 = vld [vmem:[#allocation27_spill] sm:$0xff] }
 0x7a9   :  { %2153 = vmatpush1.msra.mxu0 %v3785_v52  ;;  %2224 = vmatpush1.msra.mxu1 %v3788_v22  ;;  %v4632_v52 = vld [vmem:[#allocation26_spill] sm:$0xff]  ;;  %v4633_v22 = vld [vmem:[#allocation29_spill] sm:$0xff] }
 0x7aa   :  { %2154 = vmatprep.subr.mxu0 %v3791_v23  ;;  %2225 = vmatprep.subr.mxu1 %v3794_v24  ;;  %v4634_v23 = vld [vmem:[#allocation28_spill] sm:$0xff]  ;;  %v4635_v24 = vld [vmem:[#allocation31_spill] sm:$0xff] }
 0x7ab   :  { %2155 = vmatpush1.msra.mxu0 %v3797_v25  ;;  %2226 = vmatpush1.msra.mxu1 %v3800_v53  ;;  %v4636_v25 = vld [vmem:[#allocation30_spill] sm:$0xff]  ;;  %v4637_v53 = vld [vmem:[#allocation33_spill] sm:$0xff] }
 0x7ac   :  { %2156 = vmatprep.subr.mxu0 %v3803_v46  ;;  %2227 = vmatprep.subr.mxu1 %v3806_v47  ;;  %v4638_v46 = vmov 0.0   ;;  %v4639_v47 = vld [vmem:[#allocation32_spill] sm:$0xff] }
 0x7ad   :  { %2157 = vmatpush1.msra.mxu0 %v4554_v44  ;;  %2228 = vmatpush1.msra.mxu1 %v4555_v32 }
 0x7ae   :  { %2158 = vmatprep.subr.mxu0 %v3815_v42  ;;  %2229 = vmatprep.subr.mxu1 %v3818_v45  ;;  %v4641_v42 = vld [vmem:[#allocation85_spill] sm:$0xff] }
 0x7af   :  { %2159 = vmatpush1.msra.mxu0 %v3821_v48  ;;  %2230 = vmatpush1.msra.mxu1 %v3824_v26  ;;  %v4618_v26 = vld [vmem:[#allocation67_spill] sm:$0xff]  ;;  %v4619_v48 = vld [vmem:[#allocation42_spill] sm:$0xff] }
 0x7b0   :  { %2160 = vmatprep.subr.mxu0 %v3827_v50  ;;  %2231 = vmatprep.subr.mxu1 %v3914_v33  ;;  %v2342_v50 = vld [vmem:[%s4281_s3 + $0x78] sm:$0xff] }
 0x7b1   :  { %2161 = vmatpush1.msra.mxu0 %v3831_v61  ;;  %2232 = vmatpush1.msra.mxu1 %v3918_v34  ;;  %v4640_v61 = vld [vmem:[#allocation64_spill] sm:$0xff] }
 0x7b2   :  { %2162 = vmatprep.subr.mxu0 %v3921_v35  ;;  %2233 = vmatprep.subr.mxu1 %v3924_v36  ;;  %v698_v45 = vadd.f32 %v4641_v42, %v4640_v61  ;;  %v4642_v35 = vld [vmem:[#allocation87_spill] sm:$0xff] }
 0x7b3   :  { %2163 = vmatpush1.msra.mxu0 %v3927_v37  ;;  %2234 = vmatpush1.msra.mxu1 %v3930_v39 }
 0x7b4   :  { %2164 = vmatprep.subr.mxu0 %v3933_v9  ;;  %2235 = vmatprep.subr.mxu1 %v3936_v30  ;;  %v4643_v30 = vld [vmem:[#allocation61_spill] sm:$0xff] }
 0x7b5   :  { %2165 = vmatpush1.msra.mxu0 %v3939_v55  ;;  %2236 = vmatpush1.msra.mxu1 %v3942_v56  ;;  %v4644_v55 = vld [vmem:[#allocation88_spill] sm:$0xff] }
 0x7b6   :  { %2166 = vmatprep.subr.mxu0 %v3945_v57  ;;  %2237 = vmatprep.subr.mxu1 %v3948_v58  ;;  %v813_v56 = vadd.f32 %v4644_v55, %v4643_v30  ;;  %v4645_v58 = vld [vmem:[#allocation59_spill] sm:$0xff] }
 0x7b7   :  { %2167 = vmatpush1.msra.mxu0 %v3951_v59  ;;  %2238 = vmatpush1.msra.mxu1 %v4618_v26  ;;  %v4646_v59 = vld [vmem:[#allocation86_spill] sm:$0xff]  ;;  %v2338_v26 = vld [vmem:[%s4281_s3 + $0x58] sm:$0xff] }
 0x7b8   :  { %2168 = vmatprep.subr.mxu0 %v4619_v48  ;;  %2239 = vmatprep.subr.mxu1 %v4620_v15  ;;  %v811_v2 = vadd.f32 %v4646_v59, %v4645_v58  ;;  %v2337_v48 = vld [vmem:[%s4281_s3 + $0x50] sm:$0xff]  ;;  %v2336_v15 = vld [vmem:[%s4281_s3 + $0x48] sm:$0xff]  ;;  %v4258_v59 = vld [vmem:[%s4281_s3 + $0x80] ss:$0 sm:$0xff] }
 0x7b9   :  { %2169 = vmatpush1.msra.mxu0 %v4621_v41  ;;  %2240 = vmatpush1.msra.mxu1 %v4622_v54  ;;  %v2335_v41 = vld [vmem:[%s4281_s3 + $0x40] sm:$0xff]  ;;  %v2334_v54 = vld [vmem:[%s4281_s3 + $0x38] sm:$0xff] }
 0x7ba   :  { %2170 = vmatprep.subr.mxu0 %v4623_v63  ;;  %2241 = vmatprep.subr.mxu1 %v4624_v20  ;;  %v2333_v63 = vld [vmem:[%s4281_s3 + $0x30] sm:$0xff]  ;;  %v2332_v20 = vld [vmem:[%s4281_s3 + $0x28] sm:$0xff] }
 0x7bb   :  { %2171 = vmatpush1.msra.mxu0 %v4625_v5  ;;  %2242 = vmatpush1.msra.mxu1 %v4626_v38  ;;  %v2331_v5 = vld [vmem:[%s4281_s3 + $0x20] sm:$0xff]  ;;  %v2330_v38 = vld [vmem:[%s4281_s3 + $0x18] sm:$0xff] }
 0x7bc   :  { %2172 = vmatprep.subr.mxu0 %v4627_v49  ;;  %2243 = vmatprep.subr.mxu1 %v4628_v51  ;;  %v2329_v49 = vld [vmem:[%s4281_s3 + $0x10] sm:$0xff]  ;;  %v2328_v51 = vld [vmem:[%s4281_s3 + $0x8] sm:$0xff] }
 0x7bd   :  { %2173 = vmatpush1.msra.mxu0 %v4629_v18  ;;  %2244 = vmatpush1.msra.mxu1 %v4630_v43  ;;  %v2327_v18 = vld [vmem:[%s4281_s3] sm:$0xff]  ;;  %v4648_v43 = vld [vmem:[#allocation17_spill] sm:$0xff] }
 0x7be   :  { %2174 = vmatprep.subr.mxu0 %v4631_v40  ;;  %2245 = vmatprep.subr.mxu1 %v4632_v52  ;;  %v4649_v40 = vld [vmem:[#allocation15_spill] sm:$0xff]  ;;  %v4650_v52 = vld [vmem:[#allocation46_spill] sm:$0xff] }
 0x7bf   :  { %2175 = vmatpush1.msra.mxu0 %v4633_v22  ;;  %2246 = vmatpush1.msra.mxu1 %v4634_v23  ;;  %v4651_v22 = vld [vmem:[#allocation35_spill] sm:$0xff] }
 0x7c0   :  { %2176 = vmatprep.subr.mxu0 %v4635_v24  ;;  %2247 = vmatprep.subr.mxu1 %v4636_v25  ;;  %v4652_v23 = vld [vmem:[#allocation39_spill] sm:$0xff]  ;;  %v4653_v24 = vld [vmem:[#allocation89_spill] sm:$0xff] }
 0x7c1   :  { %2177 = vmatpush1.msra.mxu0 %v4637_v53  ;;  %2210 = vmatprep.mubr.f32.mxu0 %v4638_v46  ;;  %v704_v25 = vadd.f32 %v4653_v24, %v4652_v23 }
 0x7c2   :  { %2248 = vmatpush1.msra.mxu1 %v4639_v47  ;;  %2281 = vmatprep.mubr.f32.mxu1 %v4638_v46  ;;  %v4654_v46 = vld [vmem:[#allocation40_spill] sm:$0xff]  ;;  %v4655_v47 = vld [vmem:[#allocation91_spill] sm:$0xff] }
 0x7c3   :  { %2657 = vmatprep.subr.mxu0 %v2342_v50 }
 0x862   :  { %v2037_v44 = vpop.f32.mrf.mxu0  ;;  %v2108_v37 = vpop.f32.mrf.mxu1 }
 0x863   :  { %v2113_v32 = vadd.f32 %v2037_v44, %v698_v45  ;;  %v2115_v62 = vadd.f32 %v2108_v37, %v811_v2  ;;  %v4658_v37 = vld [vmem:[#allocation90_spill] sm:$0xff] }
 0x864   :  { %v2039_v33 = vpop.f32.mrf.mxu0  ;;  %v2110_v9 = vpop.f32.mrf.mxu1 }
 0x865   :  { %v2571_v34 = vmul.f32 -1.442695, %v2113_v32  ;;  %v2114_v36 = vadd.f32 %v2039_v33, %v4642_v35  ;;  %v2116_v57 = vadd.f32 %v2110_v9, %v813_v56  ;;  %v4656_v35 = vld [vmem:[#allocation92_spill] sm:$0xff] }
 0x867   :  { %2808 = vpow2.f32 %v2571_v34  ;;  %v2572_v39 = vmul.f32 -1.442695, %v2114_v36  ;;  %v2573_v17 = vmul.f32 -1.442695, %v2116_v57 }
 0x869   :  { %2810 = vpow2.f32 %v2572_v39 }
 0x86a   :  { %2812 = vtanh.f32 %v2115_v62 }
 0x86b   :  { %2814 = vpow2.f32 %v2573_v17 }
 0x874   :  { %v2809_v21 = vpop.eup %2808 }
 0x875   :  { %v2120_v60 = vadd.f32 1.0, %v2809_v21 }
 0x876   :  { %v2811_v6 = vpop.eup %2810 }
 0x877   :  { %2816 = vrcp.f32 %v2120_v60  ;;  %v2126_v8 = vadd.f32 1.0, %v2811_v6  ;;  %v2813_v10 = vpop.eup %2812 }
 0x878   :  { %v2815_v12 = vpop.eup %2814 }
 0x879   :  { %2818 = vrcp.f32 %v2126_v8  ;;  %v2133_v28 = vadd.f32 1.0, %v2815_v12 }
 0x87b   :  { %2820 = vrcp.f32 %v2133_v28 }
 0x884   :  { %v2817_v31 = vpop.eup %2816 }
 0x885   :  { %v2137_v7 = vmul.f32 %v2817_v31, %v2813_v10 }
 0x886   :  { %v2819_v29 = vpop.eup %2818 }
 0x887   :  { %v2136_v0 = vmul.f32 %v2819_v29, %v4112_v16  ;;  %v2340_v16 = vld [vmem:[%s4281_s3 + $0x68] sm:$0xff]  ;;  %s2994_s3 = smov [#allocation8]  }
 0x888   :  { %v2821_v13 = vpop.eup %2820  ;;  %s2479_s2 = sshll.u32 %s2994_s3, 4  ;;  %s2480_s2 = int_to_ptr.vmem [resolvable:$true] %s2479_s2 }
 0x889   :  { %v4194_v11 = vadd.f32 %v2137_v7, %v2136_v0  ;;  %s2924_s10 = scalar_lea.vmem %s2480_s2, 128  ;;  %p2929_p6 = scmp.lt.s32.totalorder %s2480_s2, %s2480_s2 }
 0x88a   :  { %p2925_p5 = scmp.ne.s32.totalorder %s2480_s2, %s2924_s10  ;;  %p2930_p7 = scmp.lt.s32.totalorder %s2924_s10, %s2924_s10 }
 0x88b   :  { %2822 = vtanh.f32 %v4194_v11 }
 0x88c   :  { %p2931_p8 = por %p2930_p7, %p2929_p6 }
 0x88e   :  { %p2932_p9 = pnand %p2931_p8, %p2925_p5 }
 0x898   :  { %v2823_v19 = vpop.eup %2822 }
 0x899   :  { %v2140_v14 = vmul.f32 %v2823_v19, %v2821_v13 }
 0x89b   :  { %2211 = vmatmul.mubr.f32.vlgmr.msra.gmra.mxu0 %v2140_v14  ;;  %2282 = vmatmul.mubr.f32.vlgmr.msra.gmra.mxu1 %v2140_v14 }
 0x89c   :  { %2658 = vmatpush3.msra.mxu0 %v2342_v50  ;;  %2689 = vmatprep.mubr.f32.mxu0 %v4647_v27  ;;  %v706_v50 = vadd.f32 %v4655_v47, %v4654_v46 }
 0x89d   :  { %2659 = vmatprep.subr.mxu0 %v2341_v4 }
 0x89e   :  { %2660 = vmatpush3.msra.mxu0 %v2341_v4 }
 0x89f   :  { %2661 = vmatprep.subr.mxu0 %v2340_v16 }
 0x8a0   :  { %2662 = vmatpush3.msra.mxu0 %v2340_v16 }
 0x8a1   :  { %2663 = vmatprep.subr.mxu0 %v2339_v1 }
 0x8a2   :  { %2664 = vmatpush3.msra.mxu0 %v2339_v1 }
 0x8a3   :  { %2665 = vmatprep.subr.mxu0 %v2338_v26 }
 0x8a4   :  { %2666 = vmatpush3.msra.mxu0 %v2338_v26 }
 0x8a5   :  { %2667 = vmatprep.subr.mxu0 %v2337_v48 }
 0x8a6   :  { %2668 = vmatpush3.msra.mxu0 %v2337_v48 }
 0x8a7   :  { %2669 = vmatprep.subr.mxu0 %v2336_v15 }
 0x8a8   :  { %2670 = vmatpush3.msra.mxu0 %v2336_v15 }
 0x8a9   :  { %2671 = vmatprep.subr.mxu0 %v2335_v41 }
 0x8aa   :  { %2672 = vmatpush3.msra.mxu0 %v2335_v41 }
 0x8ab   :  { %2673 = vmatprep.subr.mxu0 %v2334_v54 }
 0x8ac   :  { %2674 = vmatpush3.msra.mxu0 %v2334_v54 }
 0x8ad   :  { %2675 = vmatprep.subr.mxu0 %v2333_v63 }
 0x8ae   :  { %2676 = vmatpush3.msra.mxu0 %v2333_v63 }
 0x8af   :  { %2677 = vmatprep.subr.mxu0 %v2332_v20 }
 0x8b0   :  { %2678 = vmatpush3.msra.mxu0 %v2332_v20 }
 0x8b1   :  { %2679 = vmatprep.subr.mxu0 %v2331_v5 }
 0x8b2   :  { %2680 = vmatpush3.msra.mxu0 %v2331_v5 }
 0x8b3   :  { %2681 = vmatprep.subr.mxu0 %v2330_v38 }
 0x8b4   :  { %2682 = vmatpush3.msra.mxu0 %v2330_v38 }
 0x8b5   :  { %2683 = vmatprep.subr.mxu0 %v2329_v49 }
 0x8b6   :  { %2684 = vmatpush3.msra.mxu0 %v2329_v49 }
 0x8b7   :  { %2685 = vmatprep.subr.mxu0 %v2328_v51 }
 0x8b8   :  { %2686 = vmatpush3.msra.mxu0 %v2328_v51 }
 0x8b9   :  { %2687 = vmatprep.subr.mxu0 %v2327_v18 }
 0x8ba   :  { %2688 = vmatpush3.msra.mxu0 %v2327_v18 }
 0x8bb   :  { %2690 = vmatmul.mubr.f32.vlgmr.msra.gmra.mxu0 %v4648_v43 }
 0x8bc   :  { %2692 = vmatprep.mubr.f32.mxu0 %v4649_v40 }
 0x8bf   :  { %2693 = vmatmul.mubr.f32.gmra.mxu0 %v4650_v52 }
 0x8c0   :  { %2695 = vmatprep.mubr.f32.mxu0 %v4651_v22 }
 0x8c3   :  { %2696 = vmatmul.mubr.f32.gmra.mxu0 %v4115_v3  ;;  %v4657_v3 = vld [vmem:[#allocation63_spill] sm:$0xff] }
 0x8c4   :  { %2698 = vmatprep.mubr.f32.mxu0 %v2140_v14  ;;  %v817_v39 = vadd.f32 %v4658_v37, %v4657_v3 }
 0x95b   :  { %v2212_v53 = vpop.f32.mrf.mxu0  ;;  %v2283_v32 = vpop.f32.mrf.mxu1 }
 0x95c   :  { %v2288_v61 = vadd.f32 %v2212_v53, %v704_v25  ;;  %v2290_v9 = vadd.f32 %v2283_v32, %v817_v39 }
 0x95d   :  { %v2214_v42 = vpop.f32.mrf.mxu0  ;;  %v2285_v34 = vpop.f32.mrf.mxu1 }
 0x95e   :  { %v2574_v45 = vmul.f32 -1.442695, %v2288_v61  ;;  %v2289_v44 = vadd.f32 %v2214_v42, %v706_v50  ;;  %v2291_v36 = vadd.f32 %v2285_v34, %v4656_v35 }
 0x960   :  { %2824 = vpow2.f32 %v2574_v45  ;;  %v2575_v33 = vmul.f32 -1.442695, %v2289_v44  ;;  %v2576_v30 = vmul.f32 -1.442695, %v2291_v36 }
 0x962   :  { %2826 = vpow2.f32 %v2575_v33 }
 0x963   :  { %2828 = vtanh.f32 %v2290_v9 }
 0x964   :  { %2830 = vpow2.f32 %v2576_v30 }
 0x96d   :  { %v2825_v55 = vpop.eup %2824 }
 0x96e   :  { %v2295_v56 = vadd.f32 1.0, %v2825_v55 }
 0x96f   :  { %v2827_v57 = vpop.eup %2826 }
 0x970   :  { %2832 = vrcp.f32 %v2295_v56  ;;  %v2301_v58 = vadd.f32 1.0, %v2827_v57  ;;  %v2829_v2 = vpop.eup %2828 }
 0x971   :  { %v2831_v17 = vpop.eup %2830 }
 0x972   :  { %2834 = vrcp.f32 %v2301_v58  ;;  %v2308_v31 = vadd.f32 1.0, %v2831_v17 }
 0x974   :  { %2836 = vrcp.f32 %v2308_v31 }
 0x97b   :  { %v2691_v62 = vpop.f32.mrf.mxu0 }
 0x97c   :  { %v2420_v21 = vadd.f32 %v2691_v62, %v4258_v59 }
 0x97d   :  { %v2833_v60 = vpop.eup %2832  ;;  %v2414_v6 = vpop.f32.mrf.mxu0 }
 0x97e   :  { %v2312_v8 = vmul.f32 %v2833_v60, %v2829_v2  ;;  %2454 = vst [vmem:[#allocation7 + $0x8] sm:$0xff] %v2420_v21  ;;  %v2415_v10 = vadd.f32 %v4258_v59, %v2414_v6 }
 0x97f   :  { %v2835_v12 = vpop.eup %2834  ;;  %v2694_v7 = vpop.f32.mrf.mxu0 }
 0x980   :  { %v2311_v29 = vmul.f32 %v2835_v12, %v4194_v11  ;;  %2453 = vst [vmem:[#allocation7] sm:$0xff] %v2415_v10  ;;  %v2430_v28 = vadd.f32 %v2694_v7, %v4258_v59 }
 0x981   :  { %v2424_v0 = vpop.f32.mrf.mxu0  ;;  %v2837_v11 = vpop.eup %2836 }
 0x982   :  { %2456 = vst [vmem:[#allocation7 + $0x18] sm:$0xff] %v2430_v28  ;;  %v2425_v13 = vadd.f32 %v4258_v59, %v2424_v0  ;;  %v2313_v19 = vadd.f32 %v2312_v8, %v2311_v29 }
 0x983   :  { %v2697_v14 = vpop.f32.mrf.mxu0 }
 0x984   :  { %2455 = vst [vmem:[#allocation7 + $0x10] sm:$0xff] %v2425_v13  ;;  %v2440_v4 = vadd.f32 %v2697_v14, %v4258_v59  ;;  %2838 = vtanh.f32 %v2313_v19  ;;  %2318 = vst [vmem:[#allocation10] sm:$0xff] %v2313_v19 }
 0x985   :  { %v2434_v27 = vpop.f32.mrf.mxu0 }
 0x986   :  { %2458 = vst [vmem:[#allocation7 + $0x28] sm:$0xff] %v2440_v4  ;;  %v2435_v16 = vadd.f32 %v4258_v59, %v2434_v27 }
 0x988   :  { %2457 = vst [vmem:[#allocation7 + $0x20] sm:$0xff] %v2435_v16 }
 0x991   :  { %v2839_v1 = vpop.eup %2838 }
 0x992   :  { %v2315_v26 = vmul.f32 %v2839_v1, %v2837_v11 }
 0x994   :  { %2699 = vmatmul.mubr.f32.gmra.mxu0 %v2315_v26  ;;  %2317 = vst [vmem:[#allocation8] sm:$0xff] %v2315_v26 }
 0x995   :  { %2935 = shalt.err (!%p2932_p9)
}
 0x996   :  { %2482 = dma.vmem_to_hbm [thread:$0]  %s2480_s2, 128, %s4283_s5, [#allocation9]  }
 0x997   :  { %s2995_s13 = smov [#allocation10]  }
 0x998   :  { %s2489_s14 = sshll.u32 %s2995_s13, 4  ;;  %s2490_s14 = int_to_ptr.vmem [resolvable:$true] %s2489_s14 }
 0x999   :  { %s2944_s15 = scalar_lea.vmem %s2490_s14, 128  ;;  %p2949_p11 = scmp.lt.s32.totalorder %s2490_s14, %s2490_s14 }
 0x99a   :  { %p2945_p10 = scmp.ne.s32.totalorder %s2490_s14, %s2944_s15  ;;  %p2950_p12 = scmp.lt.s32.totalorder %s2944_s15, %s2944_s15 }
 0x99c   :  { %p2951_p13 = por %p2950_p12, %p2949_p11 }
 0x99e   :  { %p2952_p0 = pnand %p2951_p13, %p2945_p10 }
 0x9a0   :  { %2955 = shalt.err (!%p2952_p0)
}
 0x9a1   :  { %2492 = dma.vmem_to_hbm [thread:$0]  %s2490_s14, 128, %s4284_s6, [#allocation9]  }
 0x9a2   :  { %s2996_s18 = smov [#allocation7]  }
 0x9a3   :  { %s2466_s19 = sshll.u32 %s2996_s18, 4  ;;  %s2467_s19 = int_to_ptr.vmem [resolvable:$true] %s2466_s19 }
 0x9a4   :  { %s2964_s5 = scalar_lea.vmem %s2467_s19, 1024  ;;  %p2969_p2 = scmp.lt.s32.totalorder %s2467_s19, %s2467_s19 }
 0x9a5   :  { %p2965_p1 = scmp.ne.s32.totalorder %s2467_s19, %s2964_s5  ;;  %p2970_p3 = scmp.lt.s32.totalorder %s2964_s5, %s2964_s5 }
 0x9a7   :  { %p2971_p4 = por %p2970_p3, %p2969_p2 }
 0x9a9   :  { %p2972_p5 = pnand %p2971_p4, %p2965_p1 }
 0xa54   :  { %v2700_v48 = vpop.f32.mrf.mxu0 }
 0xa55   :  { %v2450_v15 = vadd.f32 %v2700_v48, %v4258_v59 }
 0xa56   :  { %v2444_v41 = vpop.f32.mrf.mxu0 }
 0xa57   :  { %2460 = vst [vmem:[#allocation7 + $0x38] sm:$0xff] %v2450_v15  ;;  %v2445_v54 = vadd.f32 %v4258_v59, %v2444_v41 }
 0xa59   :  { %2459 = vst [vmem:[#allocation7 + $0x30] sm:$0xff] %v2445_v54 }
 0xa5a   :  { %2975 = shalt.err (!%p2972_p5)
}
 0xa5b   :  { %s2997_s20 = smov 128   ;;  %s2998_s6 = smov 8  }
 0xa5c   :  { %2472 = dma.vmem_to_hbm [thread:$0]  %s2467_s19, 1024, %s4282_s4, [#allocation6], %s2997_s20, %s2997_s20, %s2998_s6  }
 0xa5d   :  { %2986 = dma.done.wait [#allocation6], 1024  }
 0xa5e   :  { %2987 = vsyncadd [#allocation6], 4294966272 }
 0xa5f   :  { %2988 = dma.done.wait [#allocation9], 256  }
 0xa60   :  { %2989 = vsyncadd [#allocation9], 4294967040 }
 0xa61   :  { %2502 = vsyncpa [#allocation5], 1 }
 0xa62   :  { %2503 = vsyncpa [#allocation6], 1 }
 0xa63   :  { %2504 = vsyncpa [#allocation9], 1 }

</bundles_post_ra>
